<compile_context>
chip_gen: v6e
topology: v6e:2x2x1
jax: 0.10.0
libtpu: 0.0.40
codegen_flags: <defaults>
</compile_context>

<pallas_src>
import functools

import jax
import jax.numpy as jnp
from jax.experimental import pallas as pl
from jax.experimental.pallas import tpu as pltpu

DIN = 1000     # ip2 in_features
DH = 128       # ip2 out_features / ip3 in_features
DOUT = 42      # ip3 out_features
DOUT_P = 128   # lane-dense padded output width


def _round_up(n, m):
    return ((n + m - 1) // m) * m


def _balanced_tile(batch, block_b, n_split=2):
    """Pick a batch tile so the grid has a multiple of `n_split` roughly
    equal-sized steps (v7x TensorCore balance), capped at `block_b` rows."""
    max_rows = n_split * block_b
    groups = -(-batch // max_rows)          # ceil
    steps = n_split * groups
    tb = -(-batch // steps)                 # ceil -> rows per step
    return _round_up(max(tb, 8), 8)


def _net_kernel(alpha_ref, x_ref, w2_ref, b2_ref, w3_ref, b3_ref, o_ref):
    # alpha_ref: SMEM (2,) -> [preluip1.weight, preluip2.weight]
    a1 = alpha_ref[0]
    a2 = alpha_ref[1]

    x = x_ref[...]                                     # (tb, 1000) f32

    # ip1 = preluip1(Dropout(x)); Dropout is identity in eval mode.
    ip1 = jnp.maximum(x, 0.0) + a1 * jnp.minimum(x, 0.0)

    # ip2 = preluip2(Linear(1000 -> 128)); bf16 MXU inputs, f32 accumulation.
    h2 = jnp.dot(ip1.astype(jnp.bfloat16), w2_ref[...],
                 preferred_element_type=jnp.float32) + b2_ref[...]   # (tb, 128)
    ip2 = jnp.maximum(h2, 0.0) + a2 * jnp.minimum(h2, 0.0)

    # ip3 = Linear(128 -> 128-padded); true Dout=42, padded cols are zero.
    h3 = jnp.dot(ip2.astype(jnp.bfloat16), w3_ref[...],
                 preferred_element_type=jnp.float32) + b3_ref[...]   # (tb, 128)

    o_ref[...] = h3.astype(o_ref.dtype)                # lane-dense store


def prepare_params(params):
    """One-time weight preprocessing (pad / cast / reshape) so the per-call
    forward does no host-side data movement on weights."""
    w2 = params["w2"]                      # (1000, 128) f32
    b2 = params["b2"].reshape(1, DH)       # (1, 128)   f32
    w3 = params["w3"]                      # (128, 42)  f32
    b3 = params["b3"].reshape(1, DOUT)     # (1, 42)    f32
    prepared = {
        "w2": w2.astype(jnp.bfloat16),                                   # (1000,128) bf16
        "b2": b2.astype(jnp.float32),                                    # (1,128) f32
        "w3": jnp.pad(w3, ((0, 0), (0, DOUT_P - DOUT))).astype(jnp.bfloat16),  # (128,128) bf16
        "b3": jnp.pad(b3, ((0, 0), (0, DOUT_P - DOUT))).astype(jnp.float32),   # (1,128) f32
        "alphas": params["alphas"].astype(jnp.float32),                  # (2,)
    }
    return jax.tree_util.tree_map(jax.device_put, prepared)


@functools.partial(jax.jit, static_argnames=("block_b",))
def net_forward(x, prepared, *, block_b=512):
    """x: (B, 1000) float32, prepared = prepare_params(params).
    Returns (B, 42) float32."""
    B, Din = x.shape
    assert Din == DIN, Din

    tb = _balanced_tile(B, block_b)
    grid = (pl.cdiv(B, tb),)

    out = pl.pallas_call(
        _net_kernel,
        out_shape=jax.ShapeDtypeStruct((B, DOUT_P), jnp.float32),
        grid_spec=pltpu.PrefetchScalarGridSpec(
            num_scalar_prefetch=0,
            grid=grid,
            in_specs=[
                # PReLU scalars live in SMEM.
                pl.BlockSpec(memory_space=pltpu.SMEM),
                # Per-grid-step batch tile of x; last dim = full Din (1000),
                # ragged last batch block handled by Pallas.
                pl.BlockSpec((tb, DIN), lambda i: (i, 0)),
                # Weights/biases: constant block index -> kept resident in
                # VMEM, not re-DMA'd per step.
                pl.BlockSpec((DIN, DH), lambda i: (0, 0)),
                pl.BlockSpec((1, DH), lambda i: (0, 0)),
                pl.BlockSpec((DH, DOUT_P), lambda i: (0, 0)),
                pl.BlockSpec((1, DOUT_P), lambda i: (0, 0)),
            ],
            out_specs=pl.BlockSpec((tb, DOUT_P), lambda i: (i, 0)),
        ),
        compiler_params=pltpu.CompilerParams(
            dimension_semantics=("parallel",),
            vmem_limit_bytes=32 * 1024 * 1024),
    )(prepared["alphas"], x, prepared["w2"], prepared["b2"],
      prepared["w3"], prepared["b3"])

    # Only the padded output columns need trimming; batch is never padded.
    return out[:, :DOUT]


def init_params(key):
    """Deterministic init mirroring PyTorch defaults (uniform ±1/sqrt(fan_in),
    PReLU weight = 0.25)."""
    k1, k2, k3, k4 = jax.random.split(key, 4)
    bound2 = 1.0 / jnp.sqrt(float(DIN))
    bound3 = 1.0 / jnp.sqrt(float(DH))
    params = {
        # stored as (in_features, out_features) == W.T relative to PyTorch
        "w2": jax.random.uniform(k1, (DIN, DH), jnp.float32, -bound2, bound2),
        "b2": jax.random.uniform(k2, (DH,), jnp.float32, -bound2, bound2),
        "w3": jax.random.uniform(k3, (DH, DOUT), jnp.float32, -bound3, bound3),
        "b3": jax.random.uniform(k4, (DOUT,), jnp.float32, -bound3, bound3),
        # [preluip1.weight, preluip2.weight], both init to 0.25
        "alphas": jnp.array([0.25, 0.25], dtype=jnp.float32),
    }
    return params


def net_reference(x, params):
    """Pure-JAX reference of the same forward pass (matching bf16 matmul
    inputs with f32 accumulation, like the kernel)."""
    a1, a2 = params["alphas"][0], params["alphas"][1]
    ip1 = jnp.maximum(x, 0.0) + a1 * jnp.minimum(x, 0.0)
    h2 = jnp.dot(ip1.astype(jnp.bfloat16),
                 params["w2"].astype(jnp.bfloat16),
                 preferred_element_type=jnp.float32) + params["b2"].reshape(1, DH)
    ip2 = jnp.maximum(h2, 0.0) + a2 * jnp.minimum(h2, 0.0)
    h3 = jnp.dot(ip2.astype(jnp.bfloat16),
                 params["w3"].astype(jnp.bfloat16),
                 preferred_element_type=jnp.float32) + params["b3"].reshape(1, DOUT)
    return h3


if __name__ == "__main__":
    key = jax.random.PRNGKey(0)
    pkey, xkey = jax.random.split(key)
    params = init_params(pkey)
    prepared = prepare_params(params)   # one-time weight pad/cast, off the hot path

    # Batch deliberately not a multiple of the tile: exercises the ragged
    # last-block path and yields two balanced grid steps (152/148 rows), so
    # both v7x TensorCores get near-equal work. Feature dims (1000 -> 128 ->
    # 42) are fixed by the module.
    B = 300
    x = jax.random.normal(xkey, (B, DIN), dtype=jnp.float32)

    out = net_forward(x, prepared, block_b=512)
    out = jax.block_until_ready(out)

    ref = net_reference(x, params)
    assert out.shape == (B, DOUT), out.shape
    max_err = float(jnp.max(jnp.abs(out - ref)))
    assert jnp.allclose(out, ref, atol=2e-2, rtol=2e-2), max_err

    print("KERNEL_OK")
</pallas_src>

<mosaic_0001>
module attributes {stable_mosaic.version = 11 : i64} {
  func.func @_net_kernel(%arg0: i32, %arg1: memref<2xf32, #tpu.memory_space<smem>>, %arg2: memref<152x1000xf32, #tpu.memory_space<vmem>>, %arg3: memref<1000x128xbf16, #tpu.memory_space<vmem>>, %arg4: memref<1x128xf32, #tpu.memory_space<vmem>>, %arg5: memref<128x128xbf16, #tpu.memory_space<vmem>>, %arg6: memref<1x128xf32, #tpu.memory_space<vmem>>, %arg7: memref<152x128xf32, #tpu.memory_space<vmem>>) attributes {dimension_semantics = [#tpu.dimension_semantics<parallel>], iteration_bounds = array<i64: 2>, scalar_prefetch = 0 : i64, scratch_operands = 0 : i64, tpu.core_type = #tpu.core_type<tc>, window_params = [{transform_indices = @transform_0, window_bounds = array<i64: 2>}, {transform_indices = @transform_1, window_bounds = array<i64: 152, 1000>}, {pipeline_mode = #tpu.pipeline_mode<synchronous>, transform_indices = @transform_2, window_bounds = array<i64: 1000, 128>}, {pipeline_mode = #tpu.pipeline_mode<synchronous>, transform_indices = @transform_3, window_bounds = array<i64: 1, 128>}, {pipeline_mode = #tpu.pipeline_mode<synchronous>, transform_indices = @transform_4, window_bounds = array<i64: 128, 128>}, {pipeline_mode = #tpu.pipeline_mode<synchronous>, transform_indices = @transform_5, window_bounds = array<i64: 1, 128>}, {transform_indices = @transform_6, window_bounds = array<i64: 152, 128>}]} {
    %c0 = arith.constant 0 : index
    %0 = memref.load %arg1[%c0] : memref<2xf32, #tpu.memory_space<smem>>
    %c1 = arith.constant 1 : index
    %1 = memref.load %arg1[%c1] : memref<2xf32, #tpu.memory_space<smem>>
    %c0_0 = arith.constant 0 : index
    %c0_1 = arith.constant 0 : index
    %2 = vector.load %arg2[%c0_0, %c0_1] : memref<152x1000xf32, #tpu.memory_space<vmem>>, vector<152x1000xf32>
    %cst = arith.constant 0.000000e+00 : f32
    %3 = vector.broadcast %cst : f32 to vector<152x1000xf32>
    %4 = arith.maximumf %2, %3 : vector<152x1000xf32>
    %cst_2 = arith.constant 0.000000e+00 : f32
    %5 = vector.broadcast %cst_2 : f32 to vector<152x1000xf32>
    %6 = arith.minimumf %2, %5 : vector<152x1000xf32>
    %7 = vector.broadcast %0 : f32 to vector<152x1000xf32>
    %8 = arith.mulf %7, %6 : vector<152x1000xf32>
    %9 = arith.addf %4, %8 : vector<152x1000xf32>
    %10 = arith.truncf %9 : vector<152x1000xf32> to vector<152x1000xbf16>
    %c0_3 = arith.constant 0 : index
    %c0_4 = arith.constant 0 : index
    %11 = vector.load %arg3[%c0_3, %c0_4] : memref<1000x128xbf16, #tpu.memory_space<vmem>>, vector<1000x128xbf16>
    %cst_5 = arith.constant dense<0.000000e+00> : vector<152x128xf32>
    %12 = tpu.matmul %10, %11, %cst_5 {dimension_numbers = #tpu.dot_dimension_numbers<[1], [0], [0], [1], [0, 0, 1, 1], [], []>} : vector<152x1000xbf16>, vector<1000x128xbf16>, vector<152x128xf32> -> vector<152x128xf32>
    %c0_6 = arith.constant 0 : index
    %c0_7 = arith.constant 0 : index
    %13 = vector.load %arg4[%c0_6, %c0_7] : memref<1x128xf32, #tpu.memory_space<vmem>>, vector<1x128xf32>
    %14 = vector.broadcast %13 : vector<1x128xf32> to vector<152x128xf32>
    %15 = arith.addf %12, %14 : vector<152x128xf32>
    %cst_8 = arith.constant 0.000000e+00 : f32
    %16 = vector.broadcast %cst_8 : f32 to vector<152x128xf32>
    %17 = arith.maximumf %15, %16 : vector<152x128xf32>
    %cst_9 = arith.constant 0.000000e+00 : f32
    %18 = vector.broadcast %cst_9 : f32 to vector<152x128xf32>
    %19 = arith.minimumf %15, %18 : vector<152x128xf32>
    %20 = vector.broadcast %1 : f32 to vector<152x128xf32>
    %21 = arith.mulf %20, %19 : vector<152x128xf32>
    %22 = arith.addf %17, %21 : vector<152x128xf32>
    %23 = arith.truncf %22 : vector<152x128xf32> to vector<152x128xbf16>
    %c0_10 = arith.constant 0 : index
    %c0_11 = arith.constant 0 : index
    %24 = vector.load %arg5[%c0_10, %c0_11] : memref<128x128xbf16, #tpu.memory_space<vmem>>, vector<128x128xbf16>
    %cst_12 = arith.constant dense<0.000000e+00> : vector<152x128xf32>
    %25 = tpu.matmul %23, %24, %cst_12 {dimension_numbers = #tpu.dot_dimension_numbers<[1], [0], [0], [1], [0, 0, 1, 1], [], []>} : vector<152x128xbf16>, vector<128x128xbf16>, vector<152x128xf32> -> vector<152x128xf32>
    %c0_13 = arith.constant 0 : index
    %c0_14 = arith.constant 0 : index
    %26 = vector.load %arg6[%c0_13, %c0_14] : memref<1x128xf32, #tpu.memory_space<vmem>>, vector<1x128xf32>
    %27 = vector.broadcast %26 : vector<1x128xf32> to vector<152x128xf32>
    %28 = arith.addf %25, %27 : vector<152x128xf32>
    %c0_15 = arith.constant 0 : index
    %c0_16 = arith.constant 0 : index
    %29 = vector.load %arg7[%c0_15, %c0_16] : memref<152x128xf32, #tpu.memory_space<vmem>>, vector<152x128xf32>
    tpu.vector_store %arg7[%c0_15, %c0_16], %28 {strides = array<i32>} : memref<152x128xf32, #tpu.memory_space<vmem>>, vector<152x128xf32>,
    return
  }
  func.func @transform_0(%arg0: i32) -> i32 {
    %c0_i32 = arith.constant 0 : i32
    %c0_i32_0 = arith.constant 0 : i32
    return %c0_i32 : i32
  }
  func.func @transform_1(%arg0: i32) -> (i32, i32) {
    %c0_i32 = arith.constant 0 : i32
    %c0_i32_0 = arith.constant 0 : i32
    return %arg0, %c0_i32 : i32, i32
  }
  func.func @transform_2(%arg0: i32) -> (i32, i32) {
    %c0_i32 = arith.constant 0 : i32
    %c0_i32_0 = arith.constant 0 : i32
    %c0_i32_1 = arith.constant 0 : i32
    return %c0_i32, %c0_i32_0 : i32, i32
  }
  func.func @transform_3(%arg0: i32) -> (i32, i32) {
    %c0_i32 = arith.constant 0 : i32
    %c0_i32_0 = arith.constant 0 : i32
    %c0_i32_1 = arith.constant 0 : i32
    return %c0_i32, %c0_i32_0 : i32, i32
  }
  func.func @transform_4(%arg0: i32) -> (i32, i32) {
    %c0_i32 = arith.constant 0 : i32
    %c0_i32_0 = arith.constant 0 : i32
    %c0_i32_1 = arith.constant 0 : i32
    return %c0_i32, %c0_i32_0 : i32, i32
  }
  func.func @transform_5(%arg0: i32) -> (i32, i32) {
    %c0_i32 = arith.constant 0 : i32
    %c0_i32_0 = arith.constant 0 : i32
    %c0_i32_1 = arith.constant 0 : i32
    return %c0_i32, %c0_i32_0 : i32, i32
  }
  func.func @transform_6(%arg0: i32) -> (i32, i32) {
    %c0_i32 = arith.constant 0 : i32
    %c0_i32_0 = arith.constant 0 : i32
    return %arg0, %c0_i32 : i32, i32
  }
}

</mosaic_0001>

<bundles_post_ra>
// kernel: net_forward.1
= control target key start
LH: loop header
LB: loop body
LE: loop exit
PB: predicated region body
PF: predicated region fallthrough
CT: control target
= control target key end

     0   :  { %11 = vsyncpa [#allocation4], 0  ;;  %s4020_s0 = inlined_call_operand.hbm [shape: f32[2], index: 0, kind: input, shape index: {}]   ;;  %s4021_s1 = inlined_call_operand.hbm [shape: f32[300,1000], index: 1, kind: input, shape index: {}]   ;;  %s4022_s2 = inlined_call_operand.hbm [shape: bf16[1000,128], index: 2, kind: input, shape index: {}]   ;;  %s4023_s3 = inlined_call_operand.hbm [shape: f32[1,128], index: 3, kind: input, shape index: {}]   ;;  %s4024_s4 = inlined_call_operand.hbm [shape: bf16[128,128], index: 4, kind: input, shape index: {}]   ;;  %s4025_s5 = inlined_call_operand.hbm [shape: f32[1,128], index: 5, kind: input, shape index: {}]   ;;  %s4026_s6 = inlined_call_operand.vmem [shape: f32[300,128], index: 6, kind: output, shape index: {}]  }
   0x1   :  { %12 = vsyncpa [#allocation3], 0 }
   0x2   :  { %14 = vsyncpa [#allocation3 + $0x1], 0 }
   0x3   :  { %15 = vsyncpa [#allocation7], 0 }
   0x4   :  { %16 = vsyncpa [#allocation10], 0  ;;  %s3389_s21 = smov 0   ;;  %s3391_s22 = smov 0  }
   0x5   :  { %s3393_s23 = smov 0   ;;  %s3395_s24 = smov 0  }
   0x6 LB: > { %s3344_s25 = smov [#allocation6]   ;;  %s2581_s27 = sadd.s32 4294967295, %s3342_s24   ;;  %s3342_s24 = sphi %s3395_s24, %s4042_s24   ;;  %s3338_s23 = sphi %s3393_s23, %s4041_s23   ;;  %s3334_s22 = sphi %s3391_s22, %s4040_s22   ;;  %s3330_s21 = sphi %s3389_s21, %s4039_s21  }
   0x7   : > { %s205_s26 = sshll.u32 %s3344_s25, 4  ;;  %p2583_p0 = scmp.ge.s32.totalorder %s3342_s24, 1  ;;  %s206_s26 = int_to_ptr.vmem [resolvable:$true] %s205_s26 }
   0x8   : > { %p3413_p1 = scmp.eq.s32.totalorder %s2581_s27, 0  ;;  %p184_p2 = scmp.lt.s32.totalorder %s3342_s24, 3 }
   0x9   : > { %s3345_s30 = smov [#allocation9]   ;;  %s3346_s9 = smov [#allocation8]  }
   0xa   : > { %s4031_s28 = scalar_select %p3413_p1, 1, 0 }
   0xb   : > { %p3418_p3 = pnand %p2583_p0, %p184_p2  ;;  %s229_s7 = sshll.u32 %s3345_s30, 4  ;;  %s230_s7 = int_to_ptr.vmem [resolvable:$true] %s229_s7 }
   0xc   : > { %s219_s10 = sshll.u32 %s3346_s9, 4  ;;  %s3164_s11 = scalar_lea.vmem %s206_s26, 8000  ;;  %s220_s10 = int_to_ptr.vmem [resolvable:$true] %s219_s10 }
   0xd   : > { %s4032_s29 = scalar_select %p3418_p3, 1, 0 }
   0xe   : > { %p3010_p4 = pneg %p3418_p3  ;;  %p3165_p7 = scmp.ne.s32.totalorder %s206_s26, %s3164_s11 }
   0xf   : > { %p3172_p10 = scmp.lt.s32.totalorder %s206_s26, %s206_s26  ;;  %p3173_p11 = scmp.lt.s32.totalorder %s3164_s11, %s3164_s11 }
  0x10   : > { %p3426_p5 = pnand %p3010_p4, %p3413_p1 }
  0x11   : > { %p3174_p12 = por %p3173_p11, %p3172_p10 }
  0x12   : > { %p3155_p6 = pneg %p3426_p5 }
  0x14   : > { %p3167_p8 = pnand %p3165_p7, %p3155_p6 }
  0x16   : > { %p3168_p9 = pneg %p3167_p8 }
  0x18   : > { %p3175_p13 = pnand %p3174_p12, %p3168_p9 }
  0x1a   : > { %3178 = shalt.err (!%p3175_p13)
}
  0x1b   : > { %s3347_s12 = smov 64   ;;  %s3348_s13 = smov 4  }
  0x1c   : > { %3016 = dma.hbm_to_vmem [thread:$0]  (!%p3426_p5), %s4022_s2, 8000, %s206_s26, [#allocation7], %s3347_s12, %s3347_s12, %s3348_s13  }
  0x1d   : > { %s3190_s16 = scalar_lea.vmem %s230_s7, 1024  ;;  %p3198_p7 = scmp.lt.s32.totalorder %s230_s7, %s230_s7 }
  0x1e   : > { %p3191_p0 = scmp.ne.s32.totalorder %s230_s7, %s3190_s16  ;;  %p3199_p8 = scmp.lt.s32.totalorder %s3190_s16, %s3190_s16 }
  0x20   : > { %p3193_p2 = pnand %p3191_p0, %p3155_p6  ;;  %p3200_p9 = por %p3199_p8, %p3198_p7 }
  0x22   : > { %p3194_p4 = pneg %p3193_p2 }
  0x24   : > { %p3201_p10 = pnand %p3200_p9, %p3194_p4 }
  0x26   : > { %3204 = shalt.err (!%p3201_p10)
}
  0x27   : > { %3022 = dma.hbm_to_vmem [thread:$0]  (!%p3426_p5), %s4024_s4, 1024, %s230_s7, [#allocation10], %s3347_s12, %s3347_s12, %s3348_s13  }
  0x28   : > { %s3349_s19 = smov [#allocation2]   ;;  %s3350_s26 = smov [#allocation11]  }
  0x29   : > { %3013 = dma.hbm_to_smem (!%p3426_p5), %s4020_s0, 16, %s3349_s19, [#allocation4]  }
  0x2a   : > { %s243_s30 = sshll.u32 %s3350_s26, 4  ;;  %s3227_s9 = scalar_lea.vmem %s220_s10, 16  ;;  %s244_s30 = int_to_ptr.vmem [resolvable:$true] %s243_s30 }
  0x2b   : > { %p3228_p11 = scmp.ne.s32.totalorder %s220_s10, %s3227_s9  ;;  %s3234_s11 = scalar_lea.vmem %s220_s10, 32 }
  0x2c   : > { %p3235_p0 = scmp.lt.s32.totalorder %s220_s10, %s220_s10  ;;  %p3236_p2 = scmp.lt.s32.totalorder %s3234_s11, %s3227_s9 }
  0x2d   : > { %p3230_p12 = pnand %p3228_p11, %p3155_p6 }
  0x2e   : > { %p3237_p4 = por %p3236_p2, %p3235_p0 }
  0x2f   : > { %p3231_p13 = pneg %p3230_p12 }
  0x31   : > { %p3238_p7 = pnand %p3237_p4, %p3231_p13 }
  0x33   : > { %3241 = shalt.err (!%p3238_p7)
}
  0x34   : > { %3019 = dma.hbm_to_vmem [thread:$0]  (!%p3426_p5), %s4023_s3, 16, %s220_s10, [#allocation7]  }
  0x35   : > { %s3253_s14 = scalar_lea.vmem %s244_s30, 16  ;;  %s3260_s15 = scalar_lea.vmem %s244_s30, 32 }
  0x36   : > { %p3254_p8 = scmp.ne.s32.totalorder %s244_s30, %s3253_s14  ;;  %p3261_p11 = scmp.lt.s32.totalorder %s244_s30, %s244_s30 }
  0x37   : > { %p3262_p12 = scmp.lt.s32.totalorder %s3260_s15, %s3253_s14 }
  0x38   : > { %p3256_p9 = pnand %p3254_p8, %p3155_p6 }
  0x39   : > { %p3263_p0 = por %p3262_p12, %p3261_p11 }
  0x3a   : > { %p3257_p10 = pneg %p3256_p9 }
  0x3c   : > { %p3264_p13 = pnand %p3263_p0, %p3257_p10 }
  0x3e   : > { %3267 = shalt.err (!%p3264_p13)
}
  0x3f   : > { %3025 = dma.hbm_to_vmem [thread:$0]  (!%p3426_p5), %s4025_s5, 16, %s244_s30, [#allocation10]  }
  0x40   : > { %s3474_s10 = sadd.s32 1, %s3342_s24   ;;  %s50_s18 = sadd.s32 1, %s3338_s23 }
  0x41   : > { %s47_s8 = ssub.s32 %s3342_s24, %s3474_s10  ;;  %p57_p2 = scmp.ne.s32.totalorder %s3338_s23, %s3334_s22 }
  0x42   : > { %p48_p6 = scmp.eq.s32.totalorder %s47_s8, 0  ;;  %p58_p4 = scmp.eq.s32.totalorder %s3342_s24, 0 }
  0x43   : > { %p63_p7 = scmp.ne.s32.totalorder %s3334_s22, %s3330_s21  ;;  %p3035_p10 = scmp.lt.s32.totalorder %s3342_s24, 2 }
  0x44   : > { %s3485_s19 = scalar_select %p48_p6, %s3338_s23, %s50_s18  }
  0x45   : > { %p59_p8 = por %p58_p4, %p57_p2  ;;  %p3489_p9 = por %p3413_p1, %p63_p7 }
  0x46   : > { %s254_s25 = sand.u32 1, %s3338_s23   ;;  %s2687_s30 = smul.u32 19456, %s3342_s24 }
  0x47   : > { %s4034_s20 = scalar_select %p3489_p9, 1, 0 }
  0x48   : > { %s2986_s26 = smul.u32 1216, %s254_s25  ;;  %p3496_p5 = pnand %p3035_p10, %p59_p8 }
  0x49   : > { %s3503_s21 = scalar_lea.hbm %s4021_s1, %s2687_s30  ;;  %s3507_s15 = scalar_lea.sflag [#allocation3], %s254_s25 }
  0x4a   : > { %s258_s13 = scalar_lea.vmem [#allocation5], %s2986_s26  ;;  %s3268_s16 = scalar_lea.hbm %s3503_s21, 19456 }
  0x4b   : > { %s266_s14 = sshll.u32 %s258_s13, 4  ;;  %p3269_p11 = scmp.ne.s32.totalorder %s3503_s21, %s3268_s16  ;;  %s3505_s14 = int_to_ptr.vmem [resolvable:$true] %s266_s14 }
  0x4c   : > { %p3270_p12 = pneg %p3496_p5  ;;  %s3273_s18 = scalar_lea.hbm %s4021_s1, 38912 }
  0x4d   : > { %p3274_p6 = scmp.lt.s32.totalorder %s3503_s21, %s4021_s1  ;;  %p3275_p2 = scmp.lt.s32.totalorder %s3273_s18, %s3268_s16 }
  0x4e   : > { %p3271_p0 = pnand %p3270_p12, %p3269_p11 }
  0x4f   : > { %p3276_p4 = por %p3275_p2, %p3274_p6 }
  0x50   : > { %p3272_p13 = pneg %p3271_p0 }
  0x52   : > { %p3277_p7 = pnand %p3276_p4, %p3272_p13 }
  0x54   : > { %3280 = shalt.err (!%p3277_p7)
}
  0x55   : > { %s3281_s25 = scalar_lea.vmem %s3505_s14, 19456  ;;  %s3351_s26 = smov [#allocation5]  }
  0x56   : > { %p3282_p8 = scmp.ne.s32.totalorder %s3505_s14, %s3281_s25  ;;  %s3286_s7 = sshll.u32 %s3351_s26, 4  ;;  %s3287_s7 = int_to_ptr.vmem [resolvable:$false] %s3286_s7 }
  0x57   : > { %s3288_s13 = scalar_lea.vmem %s3287_s7, 38912  ;;  %p3289_p0 = scmp.lt.s32.totalorder %s3505_s14, %s3287_s7 }
  0x58   : > { %p3284_p10 = pnand %p3282_p8, %p3270_p12  ;;  %p3290_p9 = scmp.lt.s32.totalorder %s3288_s13, %s3281_s25 }
  0x5a   : > { %p3285_p11 = pneg %p3284_p10  ;;  %p3291_p1 = por %p3290_p9, %p3289_p0 }
  0x5c   : > { %p3292_p3 = pnand %p3291_p1, %p3285_p11 }
  0x5e   : > { %3295 = shalt.err (!%p3292_p3)
}
  0x5f   : > { %s3352_s16 = smov 1024   ;;  %p4036_p12 = scmp.ne.s32.totalorder %s4032_s29, 0 }
  0x60   : > { %3029 = dma.hbm_to_vmem [thread:$0]  (!%p3496_p5), %s3503_s21, 19456, %s3505_s14, %s3507_s15, %s3352_s16, %s3352_s16, %s3347_s12  }
  0x61   : > { %278 = sbr.rel (%p4036_p12) target bundleno = 714 (0x2ca), region = 44  ;;  %p4037_p13 = scmp.ne.s32.totalorder (!%p4036_p12), %s4031_s28, 0 }
  0x66   : > { %3313 = dma.done.wait (%p4037_p13), [#allocation4], 16  }
  0x67   : > { %3315 = vsyncadd (%p4037_p13), [#allocation4], 4294967280  ;;  %s284_s17 = sand.u32 1, %s3334_s22   ;;  %p4038_p1 = scmp.ne.s32.totalorder %s4034_s20, 0 }
  0x68   : > { %s2987_s8 = smul.u32 1216, %s284_s17  ;;  %s285_s18 = scalar_lea.sflag [#allocation3], %s284_s17 }
  0x6a   : > { %s3536_s9 = scalar_lea.vmem [#allocation5], %s2987_s8 }
  0x6b   : > { %3317 = dma.done.wait (%p4038_p1), %s285_s18, 19456  }
  0x6c   : > { %3319 = vsyncadd (%p4038_p1), %s285_s18, 4294947840 }
  0x6d   : > { %3321 = dma.done.wait (%p4037_p13), [#allocation7], 8016  }
  0x6e   : > { %3323 = vsyncadd (%p4037_p13), [#allocation7], 4294959280 }
  0x6f   : > { %3325 = dma.done.wait (%p4037_p13), [#allocation10], 1040  }
  0x70   : > { %3327 = vsyncadd (%p4037_p13), [#allocation10], 4294966256 }
  0x71   : > { %309 = sfence }
  0x72   : > { %v3082_v0 = vld [vmem:[#allocation6 + $0x78] sm:$0xff]   ;;  %v3086_v4 = vld [vmem:[#allocation6 + $0x70] sm:$0xff]   ;;  %v3090_v8 = vld [vmem:[#allocation6 + $0x68] sm:$0xff]   ;;  %s342_s28 = sld [smem:[#allocation2]]  ;;  %v3353_v42 = vmov 0   ;;  %vm1723_vm0 = vcmask 1043456  }
  0x73   : > { %v3083_v1 = vld [vmem:[#allocation6 + $0x38] sm:$0xff]   ;;  %2688 = vmatprep.subr.bf16.mxu0 %v3082_v0  ;;  %v3087_v5 = vld [vmem:[#allocation6 + $0x30] sm:$0xff]   ;;  %v3091_v9 = vld [vmem:[#allocation6 + $0x28] sm:$0xff]   ;;  %vm1692_vm1 = vcmask 850944   ;;  %s2599_s29 = sld [smem:[#allocation2 + $0x1]]  ;;  %s335_s12 = smul.u32 19, %s2581_s27 }
  0x74   : > { %v3084_v2 = vld [vmem:[#allocation6 + $0xf8] sm:$0xff]   ;;  %2689 = vmatpush3.bf16.msra.mxu0 %v3083_v1  ;;  %v3088_v6 = vld [vmem:[#allocation6 + $0xf0] sm:$0xff]   ;;  %v3092_v10 = vld [vmem:[#allocation6 + $0xe8] sm:$0xff]  }
  0x75   : > { %v3085_v3 = vld [vmem:[#allocation6 + $0xb8] sm:$0xff]   ;;  %2764 = vmatprep.subr.bf16.mxu1 %v3084_v2  ;;  %2690 = vmatprep.subr.bf16.mxu0 %v3086_v4  ;;  %v3089_v7 = vld [vmem:[#allocation6 + $0xb0] sm:$0xff]   ;;  %v3093_v11 = vld [vmem:[#allocation6 + $0xa8] sm:$0xff]   ;;  %p336_p3 = scmp.lt.s32.totalorder %s335_s12, 37 }
  0x76   : > { %2765 = vmatpush3.bf16.msra.mxu1 %v3085_v3  ;;  %v3094_v12 = vld [vmem:[#allocation6 + $0x60] sm:$0xff]   ;;  %v3098_v16 = vld [vmem:[#allocation6 + $0x58] sm:$0xff]   ;;  %v3102_v20 = vld [vmem:[#allocation6 + $0x50] sm:$0xff]  }
  0x77   : > { %2766 = vmatprep.subr.bf16.mxu1 %v3088_v6  ;;  %v3095_v13 = vld [vmem:[#allocation6 + $0x20] sm:$0xff]   ;;  %v3099_v17 = vld [vmem:[#allocation6 + $0x18] sm:$0xff]   ;;  %v3103_v21 = vld [vmem:[#allocation6 + $0x10] sm:$0xff]   ;;  %s4044_s12 = smov (!%p336_p3, %s335_s12), 37 }
  0x78   : > { %2691 = vmatpush3.bf16.msra.mxu0 %v3087_v5  ;;  %v3096_v14 = vld [vmem:[#allocation6 + $0xe0] sm:$0xff]   ;;  %v3100_v18 = vld [vmem:[#allocation6 + $0xd8] sm:$0xff]   ;;  %v3104_v22 = vld [vmem:[#allocation6 + $0xd0] sm:$0xff]   ;;  %v3559_v55 = vstv %s342_s28  ;;  %s2598_s20 = sshll.u32 %s4044_s12, 3 }
  0x79   : > { %2692 = vmatprep.subr.bf16.mxu0 %v3090_v8  ;;  %v3097_v15 = vld [vmem:[#allocation6 + $0xa0] sm:$0xff]   ;;  %v3101_v19 = vld [vmem:[#allocation6 + $0x98] sm:$0xff]   ;;  %v3105_v23 = vld [vmem:[#allocation6 + $0x90] sm:$0xff]   ;;  %s3986_s15 = scalar_lea.vmem %s4026_s6, %s2598_s20 }
  0x7a   : > { %2767 = vmatpush3.bf16.msra.mxu1 %v3089_v7  ;;  %v3106_v24 = vld [vmem:[#allocation6 + $0x48] sm:$0xff]   ;;  %v3110_v28 = vld [vmem:[#allocation6 + $0x40] sm:$0xff]   ;;  %v347_v36 = vld [vmem:[%s3536_s9 + $0x18] sm:$0xff] }
  0x7b   : > { %2768 = vmatprep.subr.bf16.mxu1 %v3092_v10  ;;  %v3107_v25 = vld [vmem:[#allocation6 + $0x8] sm:$0xff]   ;;  %v3111_v29 = vld [vmem:[#allocation6] sm:$0xff]   ;;  %v355_v40 = vld [vmem:[%s3536_s9 + $0x58] sm:$0xff]  ;;  %v651_v47 = vmin.f32 %v347_v36, 0.0  ;;  %v499_v52 = vmax.f32 %v347_v36, 0.0 }
  0x7c   : > { %2693 = vmatpush3.bf16.msra.mxu0 %v3091_v9  ;;  %v3108_v26 = vld [vmem:[#allocation6 + $0xc8] sm:$0xff]   ;;  %v3112_v30 = vld [vmem:[#allocation6 + $0xc0] sm:$0xff]   ;;  %v3114_v41 = vld [vmem:[#allocation6 + $0x178] sm:$0xff]   ;;  %v659_v48 = vmin.f32 %v355_v40, 0.0  ;;  %v507_v56 = vmax.f32 %v355_v40, 0.0 }
  0x7d   : > { %2694 = vmatprep.subr.bf16.mxu0 %v3094_v12  ;;  %v3109_v27 = vld [vmem:[#allocation6 + $0x88] sm:$0xff]   ;;  %v3113_v31 = vld [vmem:[#allocation6 + $0x80] sm:$0xff]   ;;  %v346_v49 = vld [vmem:[%s3536_s9 + $0x10] sm:$0xff]  ;;  %v804_v63 = vmul.f32 %v3559_v55, %v651_v47 }
  0x7e   : > { %2769 = vmatpush3.bf16.msra.mxu1 %v3093_v11  ;;  %v345_v32 = vld [vmem:[%s3536_s9 + $0x8] sm:$0xff]  ;;  %v344_v34 = vld [vmem:[%s3536_s9] sm:$0xff]  ;;  %v354_v50 = vld [vmem:[%s3536_s9 + $0x50] sm:$0xff]  ;;  %v650_v53 = vmin.f32 %v346_v49, 0.0  ;;  %v498_v57 = vmax.f32 %v346_v49, 0.0  ;;  %v812_v0 = vmul.f32 %v3559_v55, %v659_v48 }
  0x7f   : > { %2770 = vmatprep.subr.bf16.mxu1 %v3096_v14  ;;  %v353_v33 = vld [vmem:[%s3536_s9 + $0x48] sm:$0xff]  ;;  %v352_v35 = vld [vmem:[%s3536_s9 + $0x40] sm:$0xff]  ;;  %v497_v37 = vmax.f32 %v345_v32, 0.0  ;;  %v649_v39 = vmin.f32 %v345_v32, 0.0  ;;  %v496_v44 = vmax.f32 %v344_v34, 0.0  ;;  %v648_v45 = vmin.f32 %v344_v34, 0.0 }
  0x80   : > { %2695 = vmatpush3.bf16.msra.mxu0 %v3095_v13  ;;  %v505_v38 = vmax.f32 %v353_v33, 0.0  ;;  %v657_v43 = vmin.f32 %v353_v33, 0.0  ;;  %v656_v46 = vmin.f32 %v352_v35, 0.0  ;;  %v504_v51 = vmax.f32 %v352_v35, 0.0  ;;  %v361_v3 = vld [vmem:[%s3536_s9 + $0x88] sm:$0xff]  ;;  %v3115_v8 = vld [vmem:[#allocation6 + $0x138] sm:$0xff]  }
  0x81   : > { %2696 = vmatprep.subr.bf16.mxu0 %v3098_v16  ;;  %v658_v54 = vmin.f32 %v354_v50, 0.0  ;;  %v506_v58 = vmax.f32 %v354_v50, 0.0  ;;  %v802_v59 = vmul.f32 %v3559_v55, %v649_v39  ;;  %v801_v61 = vmul.f32 %v3559_v55, %v648_v45  ;;  %v369_v9 = vld [vmem:[%s3536_s9 + $0xc8] sm:$0xff]  ;;  %v360_v10 = vld [vmem:[%s3536_s9 + $0x80] sm:$0xff]  ;;  %v3116_v16 = vld [vmem:[#allocation6 + $0x1b8] sm:$0xff]  }
  0x82   : > { %2771 = vmatpush3.bf16.msra.mxu1 %v3097_v15  ;;  %v810_v60 = vmul.f32 %v3559_v55, %v657_v43  ;;  %v809_v62 = vmul.f32 %v3559_v55, %v656_v46  ;;  %v803_v1 = vmul.f32 %v3559_v55, %v650_v53  ;;  %v368_v11 = vld [vmem:[%s3536_s9 + $0xc0] sm:$0xff]  ;;  %v956_v12 = vadd.f32 %v804_v63, %v499_v52  ;;  %v362_v40 = vld [vmem:[%s3536_s9 + $0x90] sm:$0xff]  ;;  %v377_v49 = vld [vmem:[%s3536_s9 + $0x108] sm:$0xff] }
  0x83   : > { %2772 = vmatprep.subr.bf16.mxu1 %v3100_v18  ;;  %v811_v2 = vmul.f32 %v3559_v55, %v658_v54  ;;  %v954_v4 = vadd.f32 %v802_v59, %v497_v37  ;;  %v953_v6 = vadd.f32 %v801_v61, %v496_v44  ;;  %v964_v13 = vadd.f32 %v812_v0, %v507_v56  ;;  %v3118_v43 = vld [vmem:[#allocation6 + $0x130] sm:$0xff]   ;;  %v385_v50 = vld [vmem:[%s3536_s9 + $0x148] sm:$0xff]  ;;  %v376_v56 = vld [vmem:[%s3536_s9 + $0x100] sm:$0xff] }
  0x84   : > { %2697 = vmatpush3.bf16.msra.mxu0 %v3099_v17  ;;  %v962_v5 = vadd.f32 %v810_v60, %v505_v38  ;;  %v961_v7 = vadd.f32 %v809_v62, %v504_v51  ;;  %v955_v14 = vadd.f32 %v803_v1, %v498_v57  ;;  %v363_v17 = vld [vmem:[%s3536_s9 + $0x98] sm:$0xff]  ;;  %v514_v46 = vmax.f32 %v362_v40, 0.0  ;;  %v3119_v48 = vld [vmem:[#allocation6 + $0x1b0] sm:$0xff]   ;;  %v3121_v61 = vld [vmem:[#allocation6 + $0x168] sm:$0xff]  }
  0x85   : > { %2698 = vmatprep.subr.bf16.mxu0 %v3102_v20  ;;  %v963_v15 = vadd.f32 %v811_v2, %v506_v58  ;;  %v513_v20 = vmax.f32 %v361_v3, 0.0  ;;  %v515_v34 = vmax.f32 %v363_v17, 0.0  ;;  %v667_v38 = vmin.f32 %v363_v17, 0.0  ;;  %v3122_v2 = vld [vmem:[#allocation6 + $0x128] sm:$0xff]  }
  0x86   : > { %2773 = vmatpush3.bf16.msra.mxu1 %v3101_v19  ;;  %v1106_v18 = vpack.c.bf16 %v962_v5, %v954_v4  ;;  %v1105_v19 = vpack.c.bf16 %v961_v7, %v953_v6  ;;  %v666_v58 = vmin.f32 %v362_v40, 0.0  ;;  %v529_v60 = vmax.f32 %v377_v49, 0.0  ;;  %v384_v7 = vld [vmem:[%s3536_s9 + $0x140] sm:$0xff]  ;;  %v401_v40 = vld [vmem:[%s3536_s9 + $0x1c8] sm:$0xff] }
  0x87   : > { %2774 = vmatprep.subr.bf16.mxu1 %v3104_v22  ;;  %v371_v22 = vld [vmem:[%s3536_s9 + $0xd8] sm:$0xff]  ;;  %v820_v53 = vmul.f32 %v3559_v55, %v667_v38  ;;  %v537_v1 = vmax.f32 %v385_v50, 0.0  ;;  %v681_v5 = vmin.f32 %v377_v49, 0.0  ;;  %v689_v6 = vmin.f32 %v385_v50, 0.0  ;;  %v392_v50 = vld [vmem:[%s3536_s9 + $0x180] sm:$0xff] }
  0x88   : > { %2699 = vmatpush3.bf16.msra.mxu0 %v3103_v21  ;;  %v521_v21 = vmax.f32 %v369_v9, 0.0  ;;  %1759 = vmatprep.mubr.bf16.mxu0 %v1106_v18  ;;  %v523_v35 = vmax.f32 %v371_v22, 0.0  ;;  %v675_v39 = vmin.f32 %v371_v22, 0.0  ;;  %v387_v18 = vld [vmem:[%s3536_s9 + $0x158] sm:$0xff] }
  0x89   : > { %2700 = vmatprep.subr.bf16.mxu0 %v3106_v24  ;;  %v1108_v24 = vpack.c.bf16 %v964_v13, %v956_v12  ;;  %v972_v63 = vadd.f32 %v820_v53, %v515_v34  ;;  %v680_v12 = vmin.f32 %v376_v56, 0.0  ;;  %v379_v13 = vld [vmem:[%s3536_s9 + $0x118] sm:$0xff]  ;;  %v842_v17 = vmul.f32 %v3559_v55, %v689_v6  ;;  %v393_v34 = vld [vmem:[%s3536_s9 + $0x188] sm:$0xff] }
  0x8a   : > { %2775 = vmatpush3.bf16.msra.mxu1 %v3105_v23  ;;  %v3117_v23 = vld [vmem:[#allocation6 + $0x170] sm:$0xff]   ;;  %v828_v54 = vmul.f32 %v3559_v55, %v675_v39  ;;  %v539_v22 = vmax.f32 %v387_v18, 0.0  ;;  %v697_v49 = vmin.f32 %v393_v34, 0.0 }
  0x8b   : > { %2776 = vmatprep.subr.bf16.mxu1 %v3108_v26  ;;  %v665_v26 = vmin.f32 %v361_v3, 0.0  ;;  %1871 = vmatprep.mubr.bf16.mxu1 %v1108_v24  ;;  %v819_v3 = vmul.f32 %v3559_v55, %v666_v58  ;;  %v386_v24 = vld [vmem:[%s3536_s9 + $0x150] sm:$0xff]  ;;  %v400_v58 = vld [vmem:[%s3536_s9 + $0x1c0] sm:$0xff] }
  0x8c   : > { %2701 = vmatpush3.bf16.msra.mxu0 %v3107_v25  ;;  %v1107_v25 = vpack.c.bf16 %v963_v15, %v955_v14  ;;  %v980_v0 = vadd.f32 %v828_v54, %v523_v35  ;;  %v3125_v35 = vld [vmem:[#allocation6 + $0x160] sm:$0xff]   ;;  %v538_v38 = vmax.f32 %v386_v24, 0.0 }
  0x8d   : > { %2702 = vmatprep.subr.bf16.mxu0 %v3110_v28  ;;  %v512_v28 = vmax.f32 %v360_v10, 0.0  ;;  %v818_v32 = vmul.f32 %v3559_v55, %v665_v26  ;;  %v971_v14 = vadd.f32 %v819_v3, %v514_v46  ;;  %v696_v3 = vmin.f32 %v392_v50, 0.0 }
  0x8e   : > { %2777 = vmatpush3.bf16.msra.mxu1 %v3109_v27  ;;  %v673_v27 = vmin.f32 %v369_v9, 0.0  ;;  %v1116_v9 = vpack.c.bf16 %v980_v0, %v972_v63  ;;  %v395_v63 = vld [vmem:[%s3536_s9 + $0x198] sm:$0xff] }
  0x8f   : > { %2778 = vmatprep.subr.bf16.mxu1 %v3112_v30  ;;  %v664_v30 = vmin.f32 %v360_v10, 0.0  ;;  %v970_v44 = vadd.f32 %v818_v32, %v513_v20  ;;  %v528_v10 = vmax.f32 %v376_v56, 0.0  ;;  %v833_v20 = vmul.f32 %v3559_v55, %v680_v12 }
  0x90   : > { %2703 = vmatpush3.bf16.msra.mxu0 %v3111_v29  ;;  %v520_v29 = vmax.f32 %v368_v11, 0.0  ;;  %v826_v33 = vmul.f32 %v3559_v55, %v673_v27  ;;  %v994_v27 = vadd.f32 %v842_v17, %v537_v1  ;;  %v691_v32 = vmin.f32 %v387_v18, 0.0 }
  0x91   : > { %2840 = vmatprep.subr.bf16.mxu0 %v3114_v41  ;;  %v817_v36 = vmul.f32 %v3559_v55, %v664_v30  ;;  %v370_v41 = vld [vmem:[%s3536_s9 + $0xd0] sm:$0xff] }
  0x92   : > { %2779 = vmatpush3.bf16.msra.mxu1 %v3113_v31  ;;  %v672_v31 = vmin.f32 %v368_v11, 0.0  ;;  %v978_v45 = vadd.f32 %v826_v33, %v521_v21  ;;  %v522_v47 = vmax.f32 %v370_v41, 0.0  ;;  %v674_v59 = vmin.f32 %v370_v41, 0.0 }
  0x93   : > { %2063 = vmatprep.subr.bf16.mxu1 %v3353_v42  ;;  %1760 = vmatmul.mubr.bf16.vlgmr.msra.gmra.mxu0 %v1105_v19  ;;  %v969_v51 = vadd.f32 %v817_v36, %v512_v28  ;;  %v536_v11 = vmax.f32 %v384_v7, 0.0  ;;  %v688_v19 = vmin.f32 %v384_v7, 0.0  ;;  %v531_v21 = vmax.f32 %v379_v13, 0.0 }
  0x94   : > { %2841 = vmatpush3.bf16.msra.mxu0 %v3115_v8  ;;  %v825_v37 = vmul.f32 %v3559_v55, %v672_v31  ;;  %v1114_v57 = vpack.c.bf16 %v978_v45, %v970_v44  ;;  %v827_v4 = vmul.f32 %v3559_v55, %v674_v59  ;;  %v3120_v8 = vld [vmem:[#allocation6 + $0x1a8] sm:$0xff]   ;;  %v683_v28 = vmin.f32 %v379_v13, 0.0 }
  0x95   : > { %1872 = vmatmul.mubr.bf16.vlgmr.msra.gmra.mxu1 %v1107_v25  ;;  %2842 = vmatprep.subr.bf16.mxu0 %v3117_v23  ;;  %v378_v23 = vld [vmem:[%s3536_s9 + $0x110] sm:$0xff]  ;;  %v841_v30 = vmul.f32 %v3559_v55, %v688_v19  ;;  %v985_v31 = vadd.f32 %v833_v20, %v528_v10  ;;  %v690_v44 = vmin.f32 %v386_v24, 0.0  ;;  %v545_v45 = vmax.f32 %v393_v34, 0.0  ;;  %v409_v20 = vld [vmem:[%s3536_s9 + $0x208] sm:$0xff] }
  0x96   : > { %2064 = vmatpush1.bf16.msra.mxu1 %v3116_v16  ;;  %v977_v52 = vadd.f32 %v825_v37, %v520_v29  ;;  %1767 = vmatprep.mubr.bf16.mxu0 %v1114_v57  ;;  %v979_v15 = vadd.f32 %v827_v4, %v522_v47  ;;  %v834_v16 = vmul.f32 %v3559_v55, %v681_v5  ;;  %v3123_v29 = vld [vmem:[#allocation6 + $0x1a0] sm:$0xff]   ;;  %v530_v33 = vmax.f32 %v378_v23, 0.0  ;;  %v403_v4 = vld [vmem:[%s3536_s9 + $0x1d8] sm:$0xff]  ;;  %v394_v5 = vld [vmem:[%s3536_s9 + $0x190] sm:$0xff] }
  0x97   : > { %2065 = vmatprep.subr.bf16.mxu1 %v3353_v42  ;;  %1879 = vmatprep.mubr.bf16.mxu1 %v1116_v9  ;;  %v836_v37 = vmul.f32 %v3559_v55, %v683_v28  ;;  %v682_v39 = vmin.f32 %v378_v23, 0.0  ;;  %v993_v41 = vadd.f32 %v841_v30, %v536_v11  ;;  %v843_v56 = vmul.f32 %v3559_v55, %v690_v44  ;;  %v3127_v10 = vld [vmem:[#allocation6 + $0x190] sm:$0xff]  }
  0x98   : > { %v1113_v62 = vpack.c.bf16 %v977_v52, %v969_v51  ;;  %2843 = vmatpush3.bf16.msra.mxu0 %v3118_v43  ;;  %v1115_v25 = vpack.c.bf16 %v979_v15, %v971_v14  ;;  %v986_v26 = vadd.f32 %v834_v16, %v529_v60  ;;  %v844_v43 = vmul.f32 %v3559_v55, %v691_v32  ;;  %v3124_v51 = vld [vmem:[#allocation6 + $0x198] sm:$0xff]   ;;  %v3126_v52 = vld [vmem:[#allocation6 + $0x120] sm:$0xff]   ;;  %v402_v15 = vld [vmem:[%s3536_s9 + $0x1d0] sm:$0xff] }
  0x99   : > { %2844 = vmatprep.subr.bf16.mxu0 %v3121_v61  ;;  %v988_v46 = vadd.f32 %v836_v37, %v531_v21  ;;  %v835_v47 = vmul.f32 %v3559_v55, %v682_v39  ;;  %v1121_v53 = vpack.c.bf16 %v993_v41, %v985_v31  ;;  %v705_v57 = vmin.f32 %v401_v40, 0.0  ;;  %v417_v21 = vld [vmem:[%s3536_s9 + $0x248] sm:$0xff] }
  0x9a   : > { %2066 = vmatpush1.bf16.msra.mxu1 %v3119_v48  ;;  %v1122_v36 = vpack.c.bf16 %v994_v27, %v986_v26  ;;  %v553_v48 = vmax.f32 %v401_v40, 0.0  ;;  %v996_v54 = vadd.f32 %v844_v43, %v539_v22  ;;  %v850_v60 = vmul.f32 %v3559_v55, %v697_v49  ;;  %v3129_v22 = vld [vmem:[#allocation6 + $0x158] sm:$0xff]   ;;  %v408_v27 = vld [vmem:[%s3536_s9 + $0x200] sm:$0xff]  ;;  %v3128_v32 = vld [vmem:[#allocation6 + $0x188] sm:$0xff]  }
  0x9b   : > { %2067 = vmatprep.subr.bf16.mxu1 %v3353_v42  ;;  %1768 = vmatmul.mubr.bf16.gmra.mxu0 %v1113_v62  ;;  %v987_v59 = vadd.f32 %v835_v47, %v530_v33  ;;  %v544_v61 = vmax.f32 %v392_v50, 0.0  ;;  %v552_v62 = vmax.f32 %v400_v58, 0.0  ;;  %v995_v1 = vadd.f32 %v843_v56, %v538_v38  ;;  %v3130_v33 = vld [vmem:[#allocation6 + $0x118] sm:$0xff]   ;;  %v416_v43 = vld [vmem:[%s3536_s9 + $0x240] sm:$0xff]  ;;  %v418_v56 = vld [vmem:[%s3536_s9 + $0x250] sm:$0xff] }
  0x9c   : > { %2845 = vmatpush3.bf16.msra.mxu0 %v3122_v2  ;;  %1775 = vmatprep.mubr.bf16.mxu0 %v1122_v36  ;;  %v1124_v0 = vpack.c.bf16 %v996_v54, %v988_v46  ;;  %v858_v2 = vmul.f32 %v3559_v55, %v705_v57  ;;  %v1002_v6 = vadd.f32 %v850_v60, %v545_v45  ;;  %v704_v7 = vmin.f32 %v400_v58, 0.0  ;;  %v410_v54 = vld [vmem:[%s3536_s9 + $0x210] sm:$0xff] }
  0x9d   : > { %1880 = vmatmul.mubr.bf16.gmra.mxu1 %v1115_v25  ;;  %2846 = vmatprep.subr.bf16.mxu0 %v3125_v35  ;;  %v555_v9 = vmax.f32 %v403_v4, 0.0  ;;  %v1123_v11 = vpack.c.bf16 %v995_v1, %v987_v59  ;;  %v849_v13 = vmul.f32 %v3559_v55, %v696_v3  ;;  %v699_v14 = vmin.f32 %v395_v63, 0.0 }
  0x9e   : > { %2068 = vmatpush1.bf16.msra.mxu1 %v3120_v8  ;;  %v547_v8 = vmax.f32 %v395_v63, 0.0  ;;  %1887 = vmatprep.mubr.bf16.mxu1 %v1124_v0  ;;  %v1010_v12 = vadd.f32 %v858_v2, %v553_v48  ;;  %v857_v16 = vmul.f32 %v3559_v55, %v704_v7  ;;  %v707_v17 = vmin.f32 %v403_v4, 0.0  ;;  %v411_v48 = vld [vmem:[%s3536_s9 + $0x218] sm:$0xff]  ;;  %v3132_v2 = vld [vmem:[#allocation6 + $0x150] sm:$0xff]   ;;  %v425_v7 = vld [vmem:[%s3536_s9 + $0x288] sm:$0xff] }
  0x9f   : > { %2069 = vmatprep.subr.bf16.mxu1 %v3353_v42  ;;  %v546_v18 = vmax.f32 %v394_v5, 0.0  ;;  %v554_v19 = vmax.f32 %v402_v15, 0.0  ;;  %v1001_v24 = vadd.f32 %v849_v13, %v544_v61  ;;  %v852_v25 = vmul.f32 %v3559_v55, %v699_v14  ;;  %v3131_v61 = vld [vmem:[#allocation6 + $0x180] sm:$0xff]   ;;  %v433_v13 = vld [vmem:[%s3536_s9 + $0x2c8] sm:$0xff] }
  0xa0   : > { %2847 = vmatpush3.bf16.msra.mxu0 %v3126_v52  ;;  %v1130_v23 = vpack.c.bf16 %v1010_v12, %v1002_v6  ;;  %v698_v26 = vmin.f32 %v394_v5, 0.0  ;;  %v1009_v28 = vadd.f32 %v857_v16, %v552_v62  ;;  %v706_v30 = vmin.f32 %v402_v15, 0.0 }
  0xa1   : > { %v561_v31 = vmax.f32 %v409_v20, 0.0  ;;  %2848 = vmatprep.subr.bf16.mxu0 %v3129_v22  ;;  %v1004_v34 = vadd.f32 %v852_v25, %v547_v8  ;;  %v569_v36 = vmax.f32 %v417_v21, 0.0  ;;  %v713_v37 = vmin.f32 %v409_v20, 0.0  ;;  %v3134_v8 = vld [vmem:[#allocation6 + $0x110] sm:$0xff]   ;;  %v424_v22 = vld [vmem:[%s3536_s9 + $0x280] sm:$0xff] }
  0xa2   : > { %2070 = vmatpush1.bf16.msra.mxu1 %v3123_v29  ;;  %v860_v29 = vmul.f32 %v3559_v55, %v707_v17  ;;  %v851_v35 = vmul.f32 %v3559_v55, %v698_v26  ;;  %v1129_v38 = vpack.c.bf16 %v1009_v28, %v1001_v24  ;;  %v859_v40 = vmul.f32 %v3559_v55, %v706_v30  ;;  %v427_v28 = vld [vmem:[%s3536_s9 + $0x298] sm:$0xff] }
  0xa3   : > { %2071 = vmatprep.subr.bf16.mxu1 %v3353_v42  ;;  %1776 = vmatmul.mubr.bf16.gmra.mxu0 %v1121_v53  ;;  %v721_v41 = vmin.f32 %v417_v21, 0.0  ;;  %v866_v45 = vmul.f32 %v3559_v55, %v713_v37  ;;  %v560_v46 = vmax.f32 %v408_v27, 0.0  ;;  %v568_v47 = vmax.f32 %v416_v43, 0.0  ;;  %v419_v53 = vld [vmem:[%s3536_s9 + $0x258] sm:$0xff] }
  0xa4   : > { %1783 = vmatprep.mubr.bf16.mxu0 %v1130_v23  ;;  %v1012_v39 = vadd.f32 %v860_v29, %v555_v9  ;;  %2849 = vmatpush3.bf16.msra.mxu0 %v3130_v33  ;;  %v1003_v44 = vadd.f32 %v851_v35, %v546_v18  ;;  %v1011_v50 = vadd.f32 %v859_v40, %v554_v19  ;;  %v712_v52 = vmin.f32 %v408_v27, 0.0  ;;  %v432_v27 = vld [vmem:[%s3536_s9 + $0x2c0] sm:$0xff]  ;;  %v435_v33 = vld [vmem:[%s3536_s9 + $0x2d8] sm:$0xff] }
  0xa5   : > { %1888 = vmatmul.mubr.bf16.gmra.mxu1 %v1123_v11  ;;  %v1018_v57 = vadd.f32 %v866_v45, %v561_v31  ;;  %v720_v58 = vmin.f32 %v416_v43, 0.0  ;;  %v563_v59 = vmax.f32 %v411_v48, 0.0  ;;  %v571_v60 = vmax.f32 %v419_v53, 0.0  ;;  %2850 = vmatprep.subr.bf16.mxu0 %v3132_v2  ;;  %v426_v45 = vld [vmem:[%s3536_s9 + $0x290] sm:$0xff]  ;;  %v440_v2 = vld [vmem:[%s3536_s9 + $0x300] sm:$0xff] }
  0xa6   : > { %2072 = vmatpush1.bf16.msra.mxu1 %v3124_v51  ;;  %v1132_v49 = vpack.c.bf16 %v1012_v39, %v1004_v34  ;;  %v874_v51 = vmul.f32 %v3559_v55, %v721_v41  ;;  %v1131_v62 = vpack.c.bf16 %v1011_v50, %v1003_v44  ;;  %v865_v0 = vmul.f32 %v3559_v55, %v712_v52  ;;  %v3136_v34 = vld [vmem:[#allocation6 + $0x148] sm:$0xff]   ;;  %v434_v50 = vld [vmem:[%s3536_s9 + $0x2d0] sm:$0xff] }
  0xa7   : > { %2073 = vmatprep.subr.bf16.mxu1 %v3353_v42  ;;  %v715_v1 = vmin.f32 %v411_v48, 0.0  ;;  %v873_v3 = vmul.f32 %v3559_v55, %v720_v58  ;;  %v723_v4 = vmin.f32 %v419_v53, 0.0  ;;  %v562_v5 = vmax.f32 %v410_v54, 0.0  ;;  %v3137_v39 = vld [vmem:[#allocation6 + $0x108] sm:$0xff]  }
  0xa8   : > { %1895 = vmatprep.mubr.bf16.mxu1 %v1132_v49  ;;  %v1026_v63 = vadd.f32 %v874_v51, %v569_v36  ;;  %v570_v6 = vmax.f32 %v418_v56, 0.0  ;;  %v714_v12 = vmin.f32 %v410_v54, 0.0  ;;  %v722_v16 = vmin.f32 %v418_v56, 0.0  ;;  %2851 = vmatpush3.bf16.msra.mxu0 %v3134_v8  ;;  %v441_v56 = vld [vmem:[%s3536_s9 + $0x308] sm:$0xff] }
  0xa9   : > { %v868_v11 = vmul.f32 %v3559_v55, %v715_v1  ;;  %v1025_v14 = vadd.f32 %v873_v3, %v568_v47  ;;  %v876_v15 = vmul.f32 %v3559_v55, %v723_v4  ;;  %v577_v17 = vmax.f32 %v425_v7, 0.0  ;;  %2852 = vmatprep.subr.bf16.mxu0 %v3136_v34  ;;  %v448_v3 = vld [vmem:[%s3536_s9 + $0x340] sm:$0xff]  ;;  %v450_v34 = vld [vmem:[%s3536_s9 + $0x350] sm:$0xff] }
  0xaa   : > { %2074 = vmatpush1.bf16.msra.mxu1 %v3127_v10  ;;  %v1138_v9 = vpack.c.bf16 %v1026_v63, %v1018_v57  ;;  %v1017_v10 = vadd.f32 %v865_v0, %v560_v46  ;;  %v867_v19 = vmul.f32 %v3559_v55, %v714_v12  ;;  %v585_v20 = vmax.f32 %v433_v13, 0.0  ;;  %v3140_v12 = vld [vmem:[#allocation6 + $0x140] sm:$0xff]  }
  0xab   : > { %2075 = vmatprep.subr.bf16.mxu1 %v3353_v42  ;;  %1784 = vmatmul.mubr.bf16.gmra.mxu0 %v1129_v38  ;;  %v1020_v18 = vadd.f32 %v868_v11, %v563_v59  ;;  %v729_v21 = vmin.f32 %v425_v7, 0.0  ;;  %v1028_v24 = vadd.f32 %v876_v15, %v571_v60  ;;  %v875_v25 = vmul.f32 %v3559_v55, %v722_v16 }
  0xac   : > { %1791 = vmatprep.mubr.bf16.mxu0 %v1138_v9  ;;  %v1137_v23 = vpack.c.bf16 %v1025_v14, %v1017_v10  ;;  %v737_v26 = vmin.f32 %v433_v13, 0.0  ;;  %v1019_v29 = vadd.f32 %v867_v19, %v562_v5  ;;  %v576_v31 = vmax.f32 %v424_v22, 0.0  ;;  %2853 = vmatpush3.bf16.msra.mxu0 %v3137_v39 }
  0xad   : > { %1896 = vmatmul.mubr.bf16.gmra.mxu1 %v1131_v62  ;;  %v882_v30 = vmul.f32 %v3559_v55, %v729_v21  ;;  %v1140_v35 = vpack.c.bf16 %v1028_v24, %v1020_v18  ;;  %v1027_v36 = vadd.f32 %v875_v25, %v570_v6  ;;  %v728_v38 = vmin.f32 %v424_v22, 0.0  ;;  %v451_v18 = vld [vmem:[%s3536_s9 + $0x358] sm:$0xff]  ;;  %2854 = vmatprep.subr.bf16.mxu0 %v3140_v12  ;;  %v458_v12 = vld [vmem:[%s3536_s9 + $0x390] sm:$0xff] }
  0xae   : > { %2076 = vmatpush1.bf16.msra.mxu1 %v3128_v32  ;;  %v584_v32 = vmax.f32 %v432_v27, 0.0  ;;  %v890_v37 = vmul.f32 %v3559_v55, %v737_v26  ;;  %v736_v41 = vmin.f32 %v432_v27, 0.0  ;;  %v579_v43 = vmax.f32 %v427_v28, 0.0 }
  0xaf   : > { %2077 = vmatprep.subr.bf16.mxu1 %v3353_v42  ;;  %v1034_v40 = vadd.f32 %v882_v30, %v577_v17  ;;  %v587_v44 = vmax.f32 %v435_v33, 0.0  ;;  %1903 = vmatprep.mubr.bf16.mxu1 %v1140_v35  ;;  %v1139_v46 = vpack.c.bf16 %v1027_v36, %v1019_v29  ;;  %v881_v48 = vmul.f32 %v3559_v55, %v728_v38  ;;  %v443_v17 = vld [vmem:[%s3536_s9 + $0x318] sm:$0xff]  ;;  %v3133_v29 = vld [vmem:[#allocation6 + $0x1f0] ss:$0 sps:$4 sm:$0xff]  }
  0xb0   : > { %v1042_v47 = vadd.f32 %v890_v37, %v585_v20  ;;  %v731_v49 = vmin.f32 %v427_v28, 0.0  ;;  %v889_v51 = vmul.f32 %v3559_v55, %v736_v41  ;;  %v739_v52 = vmin.f32 %v435_v33, 0.0  ;;  %v442_v28 = vld [vmem:[%s3536_s9 + $0x310] sm:$0xff] }
  0xb1   : > { %v578_v53 = vmax.f32 %v426_v45, 0.0  ;;  %v586_v54 = vmax.f32 %v434_v50, 0.0  ;;  %v1033_v58 = vadd.f32 %v881_v48, %v576_v31  ;;  %v730_v60 = vmin.f32 %v426_v45, 0.0 }
  0xb2   : > { %2078 = vmatpush1.bf16.msra.mxu1 %v3131_v61  ;;  %v1146_v57 = vpack.c.bf16 %v1042_v47, %v1034_v40  ;;  %v884_v59 = vmul.f32 %v3559_v55, %v731_v49  ;;  %v449_v61 = vld [vmem:[%s3536_s9 + $0x348] sm:$0xff]  ;;  %v1041_v62 = vadd.f32 %v889_v51, %v584_v32  ;;  %v892_v63 = vmul.f32 %v3559_v55, %v739_v52 }
  0xb3   : > { %2081 = vmatprep.subr.bf16.mxu1 %v3353_v42  ;;  %1792 = vmatmul.mubr.bf16.gmra.mxu0 %v1137_v23  ;;  %v738_v0 = vmin.f32 %v434_v50, 0.0  ;;  %v593_v1 = vmax.f32 %v441_v56, 0.0  ;;  %v883_v5 = vmul.f32 %v3559_v55, %v730_v60  ;;  %v601_v6 = vmax.f32 %v449_v61, 0.0  ;;  %v3142_v23 = vld [vmem:[#allocation6 + $0x100] sm:$0xff]   ;;  %v465_v49 = vld [vmem:[%s3536_s9 + $0x3c8] sm:$0xff] }
  0xb4   : > { %1799 = vmatprep.mubr.bf16.mxu0 %v1146_v57  ;;  %v1036_v4 = vadd.f32 %v884_v59, %v579_v43  ;;  %v745_v7 = vmin.f32 %v441_v56, 0.0  ;;  %v1145_v8 = vpack.c.bf16 %v1041_v62, %v1033_v58  ;;  %v1044_v9 = vadd.f32 %v892_v63, %v587_v44  ;;  %2855 = vmatpush3.bf16.msra.mxu0 %v3142_v23  ;;  %v457_v44 = vld [vmem:[%s3536_s9 + $0x388] sm:$0xff]  ;;  %v456_v56 = vld [vmem:[%s3536_s9 + $0x380] sm:$0xff] }
  0xb5   : > { %1904 = vmatmul.mubr.bf16.gmra.mxu1 %v1139_v46  ;;  %v891_v10 = vmul.f32 %v3559_v55, %v738_v0  ;;  %v753_v11 = vmin.f32 %v449_v61, 0.0  ;;  %v1035_v13 = vadd.f32 %v883_v5, %v578_v53  ;;  %v592_v15 = vmax.f32 %v440_v2, 0.0  ;;  %v464_v61 = vld [vmem:[%s3536_s9 + $0x3c0] sm:$0xff] }
  0xb6   : > { %v898_v14 = vmul.f32 %v3559_v55, %v745_v7  ;;  %v600_v16 = vmax.f32 %v448_v3, 0.0  ;;  %v1148_v19 = vpack.c.bf16 %v1044_v9, %v1036_v4  ;;  %v744_v22 = vmin.f32 %v440_v2, 0.0  ;;  %v459_v2 = vld [vmem:[%s3536_s9 + $0x398] sm:$0xff] }
  0xb7   : > { %v1043_v20 = vadd.f32 %v891_v10, %v586_v54  ;;  %v906_v21 = vmul.f32 %v3559_v55, %v753_v11  ;;  %v752_v25 = vmin.f32 %v448_v3, 0.0  ;;  %v595_v26 = vmax.f32 %v443_v17, 0.0  ;;  %v3135_v54 = vld [vmem:[#allocation6 + $0x1e8] sm:$0xff]   ;;  %v467_v7 = vld [vmem:[%s3536_s9 + $0x3d8] sm:$0xff] }
  0xb8   : > { %v1050_v24 = vadd.f32 %v898_v14, %v593_v1  ;;  %v603_v27 = vmax.f32 %v451_v18, 0.0  ;;  %1911 = vmatprep.mubr.bf16.mxu1 %v1148_v19  ;;  %v897_v32 = vmul.f32 %v3559_v55, %v744_v22  ;;  %v747_v33 = vmin.f32 %v443_v17, 0.0 }
  0xb9   : > { %v1147_v30 = vpack.c.bf16 %v1043_v20, %v1035_v13  ;;  %v1058_v31 = vadd.f32 %v906_v21, %v601_v6  ;;  %v905_v35 = vmul.f32 %v3559_v55, %v752_v25  ;;  %v755_v36 = vmin.f32 %v451_v18, 0.0  ;;  %v3138_v13 = vld [vmem:[#allocation6 + $0x1e0] sm:$0xff]   ;;  %v466_v18 = vld [vmem:[%s3536_s9 + $0x3d0] sm:$0xff] }
  0xba   : > { %v594_v37 = vmax.f32 %v442_v28, 0.0  ;;  %v602_v38 = vmax.f32 %v450_v34, 0.0  ;;  %v1049_v40 = vadd.f32 %v897_v32, %v592_v15  ;;  %v900_v41 = vmul.f32 %v3559_v55, %v747_v33  ;;  %v481_v32 = vld [vmem:[%s3536_s9 + $0x448] sm:$0xff]  ;;  %v3139_v33 = vld [vmem:[#allocation6 + $0x1d8] sm:$0xff]  }
  0xbb   : > { %1800 = vmatmul.mubr.bf16.gmra.mxu0 %v1145_v8  ;;  %v1154_v39 = vpack.c.bf16 %v1058_v31, %v1050_v24  ;;  %v746_v43 = vmin.f32 %v442_v28, 0.0  ;;  %v1057_v45 = vadd.f32 %v905_v35, %v600_v16  ;;  %v908_v46 = vmul.f32 %v3559_v55, %v755_v36 }
  0xbc   : > { %v754_v47 = vmin.f32 %v450_v34, 0.0  ;;  %v1725_v48 = vsel %vm1723_vm0, %v3133_v29, 0  ;;  %v1052_v50 = vadd.f32 %v900_v41, %v595_v26  ;;  %v609_v52 = vmax.f32 %v457_v44, 0.0 }
  0xbd   : > { %1912 = vmatmul.mubr.bf16.gmra.mxu1 %v1147_v30  ;;  %1807 = vmatprep.mubr.bf16.mxu0 %v1154_v39  ;;  %v899_v51 = vmul.f32 %v3559_v55, %v746_v43  ;;  %v617_v53 = vmax.f32 %v465_v49, 0.0  ;;  %v1153_v57 = vpack.c.bf16 %v1057_v45, %v1049_v40  ;;  %v1060_v58 = vadd.f32 %v908_v46, %v603_v27  ;;  %v473_v27 = vld [vmem:[%s3536_s9 + $0x408] sm:$0xff] }
  0xbe   : > { %2082 = vmatpush2.bf16.msra.mxu1 %v1725_v48  ;;  %v907_v59 = vmul.f32 %v3559_v55, %v754_v47  ;;  %v761_v60 = vmin.f32 %v457_v44, 0.0  ;;  %v769_v63 = vmin.f32 %v465_v49, 0.0  ;;  %v608_v0 = vmax.f32 %v456_v56, 0.0  ;;  %v480_v44 = vld [vmem:[%s3536_s9 + $0x440] sm:$0xff]  ;;  %v475_v49 = vld [vmem:[%s3536_s9 + $0x418] sm:$0xff] }
  0xbf   : > { %2083 = vmatprep.subr.bf16.mxu1 %v3353_v42  ;;  %v1051_v62 = vadd.f32 %v899_v51, %v594_v37  ;;  %v616_v1 = vmax.f32 %v464_v61, 0.0  ;;  %v1156_v3 = vpack.c.bf16 %v1060_v58, %v1052_v50  ;;  %v760_v6 = vmin.f32 %v456_v56, 0.0 }
  0xc0   : > { %v1059_v4 = vadd.f32 %v907_v59, %v602_v38  ;;  %v914_v5 = vmul.f32 %v3559_v55, %v761_v60  ;;  %v922_v8 = vmul.f32 %v3559_v55, %v769_v63  ;;  %v768_v9 = vmin.f32 %v464_v61, 0.0  ;;  %v472_v38 = vld [vmem:[%s3536_s9 + $0x400] sm:$0xff]  ;;  %v474_v60 = vld [vmem:[%s3536_s9 + $0x410] sm:$0xff] }
  0xc1   : > { %v611_v10 = vmax.f32 %v459_v2, 0.0  ;;  %v619_v11 = vmax.f32 %v467_v7, 0.0  ;;  %1919 = vmatprep.mubr.bf16.mxu1 %v1156_v3  ;;  %v913_v16 = vmul.f32 %v3559_v55, %v760_v6  ;;  %v763_v17 = vmin.f32 %v459_v2, 0.0  ;;  %v3141_v61 = vld [vmem:[#allocation6 + $0x1d0] sm:$0xff]  }
  0xc2   : > { %2084 = vmatpush2.bf16.msra.mxu1 %v3135_v54  ;;  %v1155_v14 = vpack.c.bf16 %v1059_v4, %v1051_v62  ;;  %v1066_v15 = vadd.f32 %v914_v5, %v609_v52  ;;  %v1074_v19 = vadd.f32 %v922_v8, %v617_v53  ;;  %v921_v20 = vmul.f32 %v3559_v55, %v768_v9  ;;  %v483_v54 = vld [vmem:[%s3536_s9 + $0x458] sm:$0xff]  ;;  %v482_v2 = vld [vmem:[%s3536_s9 + $0x450] sm:$0xff] }
  0xc3   : > { %1808 = vmatmul.mubr.bf16.gmra.mxu0 %v1153_v57  ;;  %2085 = vmatprep.subr.bf16.mxu1 %v3353_v42  ;;  %v771_v21 = vmin.f32 %v467_v7, 0.0  ;;  %v610_v22 = vmax.f32 %v458_v12, 0.0  ;;  %v1065_v23 = vadd.f32 %v913_v16, %v608_v0  ;;  %v916_v24 = vmul.f32 %v3559_v55, %v763_v17  ;;  %v489_v7 = vld [vmem:[%s3536_s9 + $0x488] sm:$0xff]  ;;  %v488_v16 = vld [vmem:[%s3536_s9 + $0x480] sm:$0xff] }
  0xc4   : > { %v618_v25 = vmax.f32 %v466_v18, 0.0  ;;  %v762_v26 = vmin.f32 %v458_v12, 0.0  ;;  %v1162_v28 = vpack.c.bf16 %v1074_v19, %v1066_v15  ;;  %v1073_v29 = vadd.f32 %v921_v20, %v616_v1  ;;  %v3143_v17 = vld [vmem:[#allocation6 + $0x1c8] sm:$0xff]  }
  0xc5   : > { %1920 = vmatmul.mubr.bf16.gmra.mxu1 %v1155_v14  ;;  %v924_v30 = vmul.f32 %v3559_v55, %v771_v21  ;;  %v770_v31 = vmin.f32 %v466_v18, 0.0  ;;  %v1068_v34 = vadd.f32 %v916_v24, %v611_v10  ;;  %v625_v36 = vmax.f32 %v473_v27, 0.0 }
  0xc6   : > { %2086 = vmatpush2.bf16.msra.mxu1 %v3138_v13  ;;  %v915_v35 = vmul.f32 %v3559_v55, %v762_v26  ;;  %v633_v37 = vmax.f32 %v481_v32, 0.0  ;;  %1815 = vmatprep.mubr.bf16.mxu0 %v1162_v28  ;;  %v1161_v39 = vpack.c.bf16 %v1073_v29, %v1065_v23  ;;  %v777_v43 = vmin.f32 %v473_v27, 0.0  ;;  %v490_v27 = vld [vmem:[%s3536_s9 + $0x490] sm:$0xff] }
  0xc7   : > { %2087 = vmatprep.subr.bf16.mxu1 %v3353_v42  ;;  %v1076_v40 = vadd.f32 %v924_v30, %v619_v11  ;;  %v923_v41 = vmul.f32 %v3559_v55, %v770_v31  ;;  %v785_v46 = vmin.f32 %v481_v32, 0.0  ;;  %v624_v47 = vmax.f32 %v472_v38, 0.0  ;;  %v349_v32 = vld [vmem:[%s3536_s9 + $0x28] sm:$0xff] }
  0xc8   : > { %v1067_v45 = vadd.f32 %v915_v35, %v610_v22  ;;  %v632_v48 = vmax.f32 %v480_v44, 0.0  ;;  %v930_v52 = vmul.f32 %v3559_v55, %v777_v43  ;;  %v776_v53 = vmin.f32 %v472_v38, 0.0  ;;  %v491_v22 = vld [vmem:[%s3536_s9 + $0x498] sm:$0xff] }
  0xc9   : > { %v1164_v50 = vpack.c.bf16 %v1076_v40, %v1068_v34  ;;  %v1075_v51 = vadd.f32 %v923_v41, %v618_v25  ;;  %v938_v56 = vmul.f32 %v3559_v55, %v785_v46  ;;  %v784_v57 = vmin.f32 %v480_v44, 0.0  ;;  %v3144_v41 = vld [vmem:[#allocation6 + $0x1c0] sm:$0xff]  }
  0xca   : > { %2088 = vmatpush2.bf16.msra.mxu1 %v3139_v33  ;;  %v627_v58 = vmax.f32 %v475_v49, 0.0  ;;  %v635_v59 = vmax.f32 %v483_v54, 0.0  ;;  %v1082_v63 = vadd.f32 %v930_v52, %v625_v36  ;;  %v929_v0 = vmul.f32 %v3559_v55, %v776_v53 }
  0xcb   : > { %1816 = vmatmul.mubr.bf16.gmra.mxu0 %v1161_v39  ;;  %2089 = vmatprep.subr.bf16.mxu1 %v3353_v42  ;;  %v1163_v62 = vpack.c.bf16 %v1075_v51, %v1067_v45  ;;  %v779_v1 = vmin.f32 %v475_v49, 0.0  ;;  %v1090_v3 = vadd.f32 %v938_v56, %v633_v37  ;;  %v937_v4 = vmul.f32 %v3559_v55, %v784_v57  ;;  %v357_v37 = vld [vmem:[%s3536_s9 + $0x68] sm:$0xff]  ;;  %v356_v49 = vld [vmem:[%s3536_s9 + $0x60] sm:$0xff]  ;;  %v359_v56 = vld [vmem:[%s3536_s9 + $0x78] sm:$0xff] }
  0xcc   : > { %1927 = vmatprep.mubr.bf16.mxu1 %v1164_v50  ;;  %v787_v5 = vmin.f32 %v483_v54, 0.0  ;;  %v626_v6 = vmax.f32 %v474_v60, 0.0  ;;  %v1081_v8 = vadd.f32 %v929_v0, %v624_v47  ;;  %v634_v10 = vmax.f32 %v482_v2, 0.0  ;;  %v351_v54 = vld [vmem:[%s3536_s9 + $0x38] sm:$0xff]  ;;  %v350_v0 = vld [vmem:[%s3536_s9 + $0x30] sm:$0xff] }
  0xcd   : > { %1928 = vmatmul.mubr.bf16.gmra.mxu1 %v1163_v62  ;;  %v932_v9 = vmul.f32 %v3559_v55, %v779_v1  ;;  %v778_v11 = vmin.f32 %v474_v60, 0.0  ;;  %v1170_v12 = vpack.c.bf16 %v1090_v3, %v1082_v63  ;;  %v1089_v13 = vadd.f32 %v937_v4, %v632_v48  ;;  %v348_v48 = vld [vmem:[%s3536_s9 + $0x20] sm:$0xff] }
  0xce   : > { %v940_v14 = vmul.f32 %v3559_v55, %v787_v5  ;;  %v786_v15 = vmin.f32 %v482_v2, 0.0  ;;  %2090 = vmatpush2.bf16.msra.mxu1 %v3141_v61  ;;  %v641_v20 = vmax.f32 %v489_v7, 0.0  ;;  %v793_v21 = vmin.f32 %v489_v7, 0.0 }
  0xcf   : > { %v1084_v18 = vadd.f32 %v932_v9, %v627_v58  ;;  %v931_v19 = vmul.f32 %v3559_v55, %v778_v11  ;;  %2091 = vmatprep.subr.bf16.mxu1 %v3353_v42  ;;  %1823 = vmatprep.mubr.bf16.mxu0 %v1170_v12  ;;  %v1169_v23 = vpack.c.bf16 %v1089_v13, %v1081_v8  ;;  %v640_v26 = vmax.f32 %v488_v16, 0.0  ;;  %v358_v9 = vld [vmem:[%s3536_s9 + $0x70] sm:$0xff] }
  0xd0   : > { %v1092_v24 = vadd.f32 %v940_v14, %v635_v59  ;;  %v939_v25 = vmul.f32 %v3559_v55, %v786_v15  ;;  %v946_v29 = vmul.f32 %v3559_v55, %v793_v21  ;;  %v792_v30 = vmin.f32 %v488_v16, 0.0  ;;  %v365_v14 = vld [vmem:[%s3536_s9 + $0xa8] sm:$0xff] }
  0xd1   : > { %v1083_v28 = vadd.f32 %v931_v19, %v626_v6  ;;  %v643_v31 = vmax.f32 %v491_v22, 0.0  ;;  %v795_v35 = vmin.f32 %v491_v22, 0.0  ;;  %v642_v36 = vmax.f32 %v490_v27, 0.0 }
  0xd2   : > { %v1172_v33 = vpack.c.bf16 %v1092_v24, %v1084_v18  ;;  %v1091_v34 = vadd.f32 %v939_v25, %v634_v10  ;;  %2092 = vmatpush2.bf16.msra.mxu1 %v3143_v17  ;;  %v1098_v38 = vadd.f32 %v946_v29, %v641_v20  ;;  %v945_v39 = vmul.f32 %v3559_v55, %v792_v30 }
  0xd3   : > { %1824 = vmatmul.mubr.bf16.gmra.mxu0 %v1169_v23  ;;  %v794_v40 = vmin.f32 %v490_v27, 0.0  ;;  %2093 = vmatprep.subr.bf16.mxu1 %v3353_v42  ;;  %v501_v43 = vmax.f32 %v349_v32, 0.0  ;;  %v948_v45 = vmul.f32 %v3559_v55, %v795_v35  ;;  %v509_v46 = vmax.f32 %v357_v37, 0.0  ;;  %v373_v23 = vld [vmem:[%s3536_s9 + $0xe8] sm:$0xff] }
  0xd4   : > { %1935 = vmatprep.mubr.bf16.mxu1 %v1172_v33  ;;  %v1171_v44 = vpack.c.bf16 %v1091_v34, %v1083_v28  ;;  %v653_v47 = vmin.f32 %v349_v32, 0.0  ;;  %v1178_v50 = vpack.c.bf16 %v1098_v38, %v1098_v38  ;;  %v1097_v51 = vadd.f32 %v945_v39, %v640_v26  ;;  %v364_v28 = vld [vmem:[%s3536_s9 + $0xa0] sm:$0xff]  ;;  %v367_v38 = vld [vmem:[%s3536_s9 + $0xb8] sm:$0xff] }
  0xd5   : > { %v947_v52 = vmul.f32 %v3559_v55, %v794_v40  ;;  %v661_v53 = vmin.f32 %v357_v37, 0.0  ;;  %v1100_v42 = vadd.f32 %v948_v45, %v643_v31  ;;  %v500_v58 = vmax.f32 %v348_v48, 0.0  ;;  %v372_v33 = vld [vmem:[%s3536_s9 + $0xe0] sm:$0xff] }
  0xd6   : > { %1936 = vmatmul.mubr.bf16.gmra.mxu1 %v1171_v44  ;;  %v806_v57 = vmul.f32 %v3559_v55, %v653_v47  ;;  %v508_v59 = vmax.f32 %v356_v49, 0.0  ;;  %1831 = vmatprep.mubr.bf16.mxu0 %v1178_v50  ;;  %v1177_v60 = vpack.c.bf16 %v1097_v51, %v1097_v51  ;;  %v652_v63 = vmin.f32 %v348_v48, 0.0  ;;  %v375_v44 = vld [vmem:[%s3536_s9 + $0xf8] sm:$0xff] }
  0xd7   : > { %v1099_v61 = vadd.f32 %v947_v52, %v642_v36  ;;  %2094 = vmatpush2.bf16.msra.mxu1 %v3144_v41  ;;  %v814_v62 = vmul.f32 %v3559_v55, %v661_v53  ;;  %v1180_v1 = vpack.c.bf16 %v1100_v42, %v1100_v42  ;;  %v660_v3 = vmin.f32 %v356_v49, 0.0  ;;  %v366_v49 = vld [vmem:[%s3536_s9 + $0xb0] sm:$0xff] }
  0xd8   : > { %v958_v2 = vadd.f32 %v806_v57, %v501_v43  ;;  %v503_v4 = vmax.f32 %v351_v54, 0.0  ;;  %v805_v7 = vmul.f32 %v3559_v55, %v652_v63  ;;  %v511_v8 = vmax.f32 %v359_v56, 0.0  ;;  %v381_v63 = vld [vmem:[%s3536_s9 + $0x128] sm:$0xff] }
  0xd9   : > { %v1179_v5 = vpack.c.bf16 %v1099_v61, %v1099_v61  ;;  %v966_v6 = vadd.f32 %v814_v62, %v509_v46  ;;  %1943 = vmatprep.mubr.bf16.mxu1 %v1180_v1  ;;  %v813_v10 = vmul.f32 %v3559_v55, %v660_v3  ;;  %v655_v11 = vmin.f32 %v351_v54, 0.0  ;;  %v374_v54 = vld [vmem:[%s3536_s9 + $0xf0] sm:$0xff] }
  0xda   : > { %v663_v12 = vmin.f32 %v359_v56, 0.0  ;;  %v502_v13 = vmax.f32 %v350_v0, 0.0  ;;  %v957_v16 = vadd.f32 %v805_v7, %v500_v58  ;;  %v510_v17 = vmax.f32 %v358_v9, 0.0 }
  0xdb   : > { %1832 = vmatmul.mubr.bf16.gmra.mxu0 %v1177_v60  ;;  %v1110_v15 = vpack.c.bf16 %v966_v6, %v958_v2  ;;  %v654_v18 = vmin.f32 %v350_v0, 0.0  ;;  %v965_v19 = vadd.f32 %v813_v10, %v508_v59  ;;  %v808_v20 = vmul.f32 %v3559_v55, %v655_v11 }
  0xdc   : > { %v816_v21 = vmul.f32 %v3559_v55, %v663_v12  ;;  %v662_v22 = vmin.f32 %v358_v9, 0.0  ;;  %v517_v25 = vmax.f32 %v365_v14, 0.0  ;;  %v525_v26 = vmax.f32 %v373_v23, 0.0  ;;  %v380_v9 = vld [vmem:[%s3536_s9 + $0x120] sm:$0xff] }
  0xdd   : > { %1983 = vmatprep.mubr.bf16.mxu0 %v1110_v15  ;;  %v807_v24 = vmul.f32 %v3559_v55, %v654_v18  ;;  %v669_v27 = vmin.f32 %v365_v14, 0.0  ;;  %v1109_v29 = vpack.c.bf16 %v965_v19, %v957_v16  ;;  %v960_v30 = vadd.f32 %v808_v20, %v503_v4  ;;  %v389_v4 = vld [vmem:[%s3536_s9 + $0x168] sm:$0xff]  ;;  %v388_v14 = vld [vmem:[%s3536_s9 + $0x160] sm:$0xff]  ;;  %v383_v19 = vld [vmem:[%s3536_s9 + $0x138] sm:$0xff] }
  0xde   : > { %1944 = vmatmul.mubr.bf16.gmra.mxu1 %v1179_v5  ;;  %v968_v31 = vadd.f32 %v816_v21, %v511_v8  ;;  %v815_v32 = vmul.f32 %v3559_v55, %v662_v22  ;;  %v677_v35 = vmin.f32 %v373_v23, 0.0  ;;  %v516_v37 = vmax.f32 %v364_v28, 0.0 }
  0xdf   : > { %v959_v34 = vadd.f32 %v807_v24, %v502_v13  ;;  %v822_v36 = vmul.f32 %v3559_v55, %v669_v27  ;;  %v524_v41 = vmax.f32 %v372_v33, 0.0  ;;  %v668_v43 = vmin.f32 %v364_v28, 0.0  ;;  %v391_v24 = vld [vmem:[%s3536_s9 + $0x178] sm:$0xff] }
  0xe0   : > { %v1112_v39 = vpack.c.bf16 %v968_v31, %v960_v30  ;;  %v967_v40 = vadd.f32 %v815_v32, %v510_v17  ;;  %v830_v45 = vmul.f32 %v3559_v55, %v677_v35  ;;  %v676_v47 = vmin.f32 %v372_v33, 0.0 }
  0xe1   : > { %v974_v46 = vadd.f32 %v822_v36, %v517_v25  ;;  %v519_v48 = vmax.f32 %v367_v38, 0.0  ;;  %v821_v51 = vmul.f32 %v3559_v55, %v668_v43  ;;  %v527_v52 = vmax.f32 %v375_v44, 0.0 }
  0xe2   : > { %2664 = vmatprep.mubr.msk.bf16.mxu1 %vm1692_vm1, %v1112_v39  ;;  %v1111_v50 = vpack.c.bf16 %v967_v40, %v959_v34  ;;  %v671_v53 = vmin.f32 %v367_v38, 0.0  ;;  %v982_v56 = vadd.f32 %v830_v45, %v525_v26  ;;  %v829_v42 = vmul.f32 %v3559_v55, %v676_v47  ;;  %v390_v34 = vld [vmem:[%s3536_s9 + $0x170] sm:$0xff] }
  0xe3   : > { %1984 = vmatmul.mubr.bf16.vlgmr.msra.gmra.mxu0 %v1109_v29  ;;  %v679_v57 = vmin.f32 %v375_v44, 0.0  ;;  %v518_v58 = vmax.f32 %v366_v49, 0.0  ;;  %v973_v59 = vadd.f32 %v821_v51, %v516_v37  ;;  %v526_v61 = vmax.f32 %v374_v54, 0.0  ;;  %v382_v29 = vld [vmem:[%s3536_s9 + $0x130] sm:$0xff]  ;;  %v397_v44 = vld [vmem:[%s3536_s9 + $0x1a8] sm:$0xff] }
  0xe4   : > { %v824_v60 = vmul.f32 %v3559_v55, %v671_v53  ;;  %v670_v62 = vmin.f32 %v366_v49, 0.0  ;;  %v1118_v0 = vpack.c.bf16 %v982_v56, %v974_v46  ;;  %v981_v1 = vadd.f32 %v829_v42, %v524_v41  ;;  %v405_v49 = vld [vmem:[%s3536_s9 + $0x1e8] sm:$0xff] }
  0xe5   : > { %v832_v2 = vmul.f32 %v3559_v55, %v679_v57  ;;  %v678_v3 = vmin.f32 %v374_v54, 0.0  ;;  %v533_v7 = vmax.f32 %v381_v63, 0.0  ;;  %v541_v8 = vmax.f32 %v389_v4, 0.0  ;;  %v396_v54 = vld [vmem:[%s3536_s9 + $0x1a0] sm:$0xff] }
  0xe6   : > { %2096 = vmatmul.mubr.bf16.vlgmr.msra.gmra.mxu1 %v1111_v50  ;;  %v976_v5 = vadd.f32 %v824_v60, %v519_v48  ;;  %v823_v6 = vmul.f32 %v3559_v55, %v670_v62  ;;  %1991 = vmatprep.mubr.bf16.mxu0 %v1118_v0  ;;  %v1117_v10 = vpack.c.bf16 %v981_v1, %v973_v59  ;;  %v685_v13 = vmin.f32 %v381_v63, 0.0  ;;  %v404_v59 = vld [vmem:[%s3536_s9 + $0x1e0] sm:$0xff]  ;;  %v399_v0 = vld [vmem:[%s3536_s9 + $0x1b8] sm:$0xff] }
  0xe7   : > { %v984_v11 = vadd.f32 %v832_v2, %v527_v52  ;;  %v831_v12 = vmul.f32 %v3559_v55, %v678_v3  ;;  %v693_v16 = vmin.f32 %v389_v4, 0.0  ;;  %v532_v17 = vmax.f32 %v380_v9, 0.0 }
  0xe8   : > { %v975_v15 = vadd.f32 %v823_v6, %v518_v58  ;;  %v540_v18 = vmax.f32 %v388_v14, 0.0  ;;  %v838_v22 = vmul.f32 %v3559_v55, %v685_v13  ;;  %v684_v23 = vmin.f32 %v380_v9, 0.0 }
  0xe9   : > { %v1120_v20 = vpack.c.bf16 %v984_v11, %v976_v5  ;;  %v983_v21 = vadd.f32 %v831_v12, %v526_v61  ;;  %v846_v25 = vmul.f32 %v3559_v55, %v693_v16  ;;  %v692_v26 = vmin.f32 %v388_v14, 0.0  ;;  %v407_v5 = vld [vmem:[%s3536_s9 + $0x1f8] sm:$0xff] }
  0xea   : > { %v535_v27 = vmax.f32 %v383_v19, 0.0  ;;  %v543_v28 = vmax.f32 %v391_v24, 0.0  ;;  %v990_v31 = vadd.f32 %v838_v22, %v533_v7  ;;  %v837_v32 = vmul.f32 %v3559_v55, %v684_v23 }
  0xeb   : > { %1992 = vmatmul.mubr.bf16.gmra.mxu0 %v1117_v10  ;;  %2665 = vmatprep.mubr.msk.bf16.mxu1 %vm1692_vm1, %v1120_v20  ;;  %v1119_v30 = vpack.c.bf16 %v983_v21, %v975_v15  ;;  %v687_v33 = vmin.f32 %v383_v19, 0.0  ;;  %v998_v35 = vadd.f32 %v846_v25, %v541_v8  ;;  %v845_v36 = vmul.f32 %v3559_v55, %v692_v26  ;;  %v398_v10 = vld [vmem:[%s3536_s9 + $0x1b0] sm:$0xff] }
  0xec   : > { %v695_v37 = vmin.f32 %v391_v24, 0.0  ;;  %v534_v38 = vmax.f32 %v382_v29, 0.0  ;;  %v989_v39 = vadd.f32 %v837_v32, %v532_v17  ;;  %v542_v41 = vmax.f32 %v390_v34, 0.0  ;;  %v406_v15 = vld [vmem:[%s3536_s9 + $0x1f0] sm:$0xff]  ;;  %v413_v24 = vld [vmem:[%s3536_s9 + $0x228] sm:$0xff] }
  0xed   : > { %v840_v40 = vmul.f32 %v3559_v55, %v687_v33  ;;  %v686_v43 = vmin.f32 %v382_v29, 0.0  ;;  %v1126_v45 = vpack.c.bf16 %v998_v35, %v990_v31  ;;  %v997_v46 = vadd.f32 %v845_v36, %v540_v18  ;;  %v421_v29 = vld [vmem:[%s3536_s9 + $0x268] sm:$0xff] }
  0xee   : > { %2104 = vmatmul.mubr.bf16.gmra.mxu1 %v1119_v30  ;;  %v848_v47 = vmul.f32 %v3559_v55, %v695_v37  ;;  %v694_v48 = vmin.f32 %v390_v34, 0.0  ;;  %v549_v52 = vmax.f32 %v397_v44, 0.0  ;;  %v557_v53 = vmax.f32 %v405_v49, 0.0  ;;  %v412_v34 = vld [vmem:[%s3536_s9 + $0x220] sm:$0xff] }
  0xef   : > { %v992_v50 = vadd.f32 %v840_v40, %v535_v27  ;;  %v839_v51 = vmul.f32 %v3559_v55, %v686_v43  ;;  %1999 = vmatprep.mubr.bf16.mxu0 %v1126_v45  ;;  %v1125_v56 = vpack.c.bf16 %v997_v46, %v989_v39  ;;  %v701_v58 = vmin.f32 %v397_v44, 0.0  ;;  %v420_v39 = vld [vmem:[%s3536_s9 + $0x260] sm:$0xff]  ;;  %v415_v45 = vld [vmem:[%s3536_s9 + $0x238] sm:$0xff] }
  0xf0   : > { %v1000_v42 = vadd.f32 %v848_v47, %v543_v28  ;;  %v847_v57 = vmul.f32 %v3559_v55, %v694_v48  ;;  %v709_v61 = vmin.f32 %v405_v49, 0.0  ;;  %v548_v62 = vmax.f32 %v396_v54, 0.0 }
  0xf1   : > { %v991_v60 = vadd.f32 %v839_v51, %v534_v38  ;;  %v556_v63 = vmax.f32 %v404_v59, 0.0  ;;  %v854_v3 = vmul.f32 %v3559_v55, %v701_v58  ;;  %v700_v4 = vmin.f32 %v396_v54, 0.0 }
  0xf2   : > { %v1128_v1 = vpack.c.bf16 %v1000_v42, %v992_v50  ;;  %v999_v2 = vadd.f32 %v847_v57, %v542_v41  ;;  %v862_v6 = vmul.f32 %v3559_v55, %v709_v61  ;;  %v708_v7 = vmin.f32 %v404_v59, 0.0  ;;  %v423_v50 = vld [vmem:[%s3536_s9 + $0x278] sm:$0xff] }
  0xf3   : > { %2000 = vmatmul.mubr.bf16.gmra.mxu0 %v1125_v56  ;;  %v551_v8 = vmax.f32 %v399_v0, 0.0  ;;  %v559_v9 = vmax.f32 %v407_v5, 0.0  ;;  %v1006_v12 = vadd.f32 %v854_v3, %v549_v52  ;;  %v853_v13 = vmul.f32 %v3559_v55, %v700_v4  ;;  %v414_v56 = vld [vmem:[%s3536_s9 + $0x230] sm:$0xff] }
  0xf4   : > { %2666 = vmatprep.mubr.msk.bf16.mxu1 %vm1692_vm1, %v1128_v1  ;;  %v1127_v11 = vpack.c.bf16 %v999_v2, %v991_v60  ;;  %v703_v14 = vmin.f32 %v399_v0, 0.0  ;;  %v1014_v16 = vadd.f32 %v862_v6, %v557_v53  ;;  %v861_v17 = vmul.f32 %v3559_v55, %v708_v7  ;;  %v422_v60 = vld [vmem:[%s3536_s9 + $0x270] sm:$0xff] }
  0xf5   : > { %v711_v18 = vmin.f32 %v407_v5, 0.0  ;;  %v550_v19 = vmax.f32 %v398_v10, 0.0  ;;  %v1005_v20 = vadd.f32 %v853_v13, %v548_v62  ;;  %v558_v22 = vmax.f32 %v406_v15, 0.0  ;;  %v429_v5 = vld [vmem:[%s3536_s9 + $0x2a8] sm:$0xff] }
  0xf6   : > { %2112 = vmatmul.mubr.bf16.gmra.mxu1 %v1127_v11  ;;  %v856_v21 = vmul.f32 %v3559_v55, %v703_v14  ;;  %v702_v23 = vmin.f32 %v398_v10, 0.0  ;;  %v1134_v25 = vpack.c.bf16 %v1014_v16, %v1006_v12  ;;  %v1013_v26 = vadd.f32 %v861_v17, %v556_v63  ;;  %v437_v10 = vld [vmem:[%s3536_s9 + $0x2e8] sm:$0xff] }
  0xf7   : > { %v864_v27 = vmul.f32 %v3559_v55, %v711_v18  ;;  %v710_v28 = vmin.f32 %v406_v15, 0.0  ;;  %v565_v32 = vmax.f32 %v413_v24, 0.0  ;;  %v573_v33 = vmax.f32 %v421_v29, 0.0  ;;  %v428_v15 = vld [vmem:[%s3536_s9 + $0x2a0] sm:$0xff] }
  0xf8   : > { %v1008_v30 = vadd.f32 %v856_v21, %v551_v8  ;;  %v855_v31 = vmul.f32 %v3559_v55, %v702_v23  ;;  %2007 = vmatprep.mubr.bf16.mxu0 %v1134_v25  ;;  %v1133_v35 = vpack.c.bf16 %v1013_v26, %v1005_v20  ;;  %v717_v38 = vmin.f32 %v413_v24, 0.0  ;;  %v436_v20 = vld [vmem:[%s3536_s9 + $0x2e0] sm:$0xff]  ;;  %v431_v25 = vld [vmem:[%s3536_s9 + $0x2b8] sm:$0xff] }
  0xf9   : > { %v1016_v36 = vadd.f32 %v864_v27, %v559_v9  ;;  %v863_v37 = vmul.f32 %v3559_v55, %v710_v28  ;;  %v725_v41 = vmin.f32 %v421_v29, 0.0  ;;  %v564_v43 = vmax.f32 %v412_v34, 0.0 }
  0xfa   : > { %v1007_v40 = vadd.f32 %v855_v31, %v550_v19  ;;  %v572_v44 = vmax.f32 %v420_v39, 0.0  ;;  %v870_v48 = vmul.f32 %v3559_v55, %v717_v38  ;;  %v716_v49 = vmin.f32 %v412_v34, 0.0 }
  0xfb   : > { %2008 = vmatmul.mubr.bf16.gmra.mxu0 %v1133_v35  ;;  %v1136_v46 = vpack.c.bf16 %v1016_v36, %v1008_v30  ;;  %v1015_v47 = vadd.f32 %v863_v37, %v558_v22  ;;  %v878_v51 = vmul.f32 %v3559_v55, %v725_v41  ;;  %v724_v52 = vmin.f32 %v420_v39, 0.0  ;;  %v439_v30 = vld [vmem:[%s3536_s9 + $0x2f8] sm:$0xff]  ;;  %v430_v35 = vld [vmem:[%s3536_s9 + $0x2b0] sm:$0xff] }
  0xfc   : > { %v567_v53 = vmax.f32 %v415_v45, 0.0  ;;  %v575_v54 = vmax.f32 %v423_v50, 0.0  ;;  %v1022_v57 = vadd.f32 %v870_v48, %v565_v32  ;;  %v869_v58 = vmul.f32 %v3559_v55, %v716_v49 }
  0xfd   : > { %2667 = vmatprep.mubr.msk.bf16.mxu1 %vm1692_vm1, %v1136_v46  ;;  %v1135_v42 = vpack.c.bf16 %v1015_v47, %v1007_v40  ;;  %v719_v59 = vmin.f32 %v415_v45, 0.0  ;;  %v1030_v61 = vadd.f32 %v878_v51, %v573_v33  ;;  %v877_v62 = vmul.f32 %v3559_v55, %v724_v52  ;;  %v438_v40 = vld [vmem:[%s3536_s9 + $0x2f0] sm:$0xff] }
  0xfe   : > { %v727_v63 = vmin.f32 %v423_v50, 0.0  ;;  %v566_v0 = vmax.f32 %v414_v56, 0.0  ;;  %v1021_v1 = vadd.f32 %v869_v58, %v564_v43  ;;  %v574_v3 = vmax.f32 %v422_v60, 0.0  ;;  %v445_v50 = vld [vmem:[%s3536_s9 + $0x328] sm:$0xff] }
  0xff   : > { %2120 = vmatmul.mubr.bf16.gmra.mxu1 %v1135_v42  ;;  %v872_v2 = vmul.f32 %v3559_v55, %v719_v59  ;;  %v718_v4 = vmin.f32 %v414_v56, 0.0  ;;  %v1142_v6 = vpack.c.bf16 %v1030_v61, %v1022_v57  ;;  %v1029_v7 = vadd.f32 %v877_v62, %v572_v44  ;;  %v453_v56 = vld [vmem:[%s3536_s9 + $0x368] sm:$0xff] }
 0x100   : > { %v880_v8 = vmul.f32 %v3559_v55, %v727_v63  ;;  %v726_v9 = vmin.f32 %v422_v60, 0.0  ;;  %v581_v13 = vmax.f32 %v429_v5, 0.0  ;;  %v589_v14 = vmax.f32 %v437_v10, 0.0  ;;  %v444_v60 = vld [vmem:[%s3536_s9 + $0x320] sm:$0xff] }
 0x101   : > { %v1024_v11 = vadd.f32 %v872_v2, %v567_v53  ;;  %v871_v12 = vmul.f32 %v3559_v55, %v718_v4  ;;  %2015 = vmatprep.mubr.bf16.mxu0 %v1142_v6  ;;  %v1141_v16 = vpack.c.bf16 %v1029_v7, %v1021_v1  ;;  %v733_v19 = vmin.f32 %v429_v5, 0.0  ;;  %v452_v1 = vld [vmem:[%s3536_s9 + $0x360] sm:$0xff]  ;;  %v447_v6 = vld [vmem:[%s3536_s9 + $0x338] sm:$0xff] }
 0x102   : > { %v1032_v17 = vadd.f32 %v880_v8, %v575_v54  ;;  %v879_v18 = vmul.f32 %v3559_v55, %v726_v9  ;;  %v741_v22 = vmin.f32 %v437_v10, 0.0  ;;  %v580_v23 = vmax.f32 %v428_v15, 0.0 }
 0x103   : > { %v1023_v21 = vadd.f32 %v871_v12, %v566_v0  ;;  %v588_v24 = vmax.f32 %v436_v20, 0.0  ;;  %2016 = vmatmul.mubr.bf16.gmra.mxu0 %v1141_v16  ;;  %v886_v28 = vmul.f32 %v3559_v55, %v733_v19  ;;  %v732_v29 = vmin.f32 %v428_v15, 0.0  ;;  %v446_v16 = vld [vmem:[%s3536_s9 + $0x330] sm:$0xff] }
 0x104   : > { %v1144_v26 = vpack.c.bf16 %v1032_v17, %v1024_v11  ;;  %v1031_v27 = vadd.f32 %v879_v18, %v574_v3  ;;  %v894_v31 = vmul.f32 %v3559_v55, %v741_v22  ;;  %v740_v32 = vmin.f32 %v436_v20, 0.0  ;;  %v455_v11 = vld [vmem:[%s3536_s9 + $0x378] sm:$0xff] }
 0x105   : > { %v583_v33 = vmax.f32 %v431_v25, 0.0  ;;  %v591_v34 = vmax.f32 %v439_v30, 0.0  ;;  %v1038_v37 = vadd.f32 %v886_v28, %v581_v13  ;;  %v885_v38 = vmul.f32 %v3559_v55, %v732_v29 }
 0x106   : > { %2668 = vmatprep.mubr.msk.bf16.mxu1 %vm1692_vm1, %v1144_v26  ;;  %v1143_v36 = vpack.c.bf16 %v1031_v27, %v1023_v21  ;;  %v735_v39 = vmin.f32 %v431_v25, 0.0  ;;  %v1046_v41 = vadd.f32 %v894_v31, %v589_v14  ;;  %v893_v43 = vmul.f32 %v3559_v55, %v740_v32  ;;  %v454_v21 = vld [vmem:[%s3536_s9 + $0x370] sm:$0xff] }
 0x107   : > { %v743_v44 = vmin.f32 %v439_v30, 0.0  ;;  %v582_v45 = vmax.f32 %v430_v35, 0.0  ;;  %v1037_v46 = vadd.f32 %v885_v38, %v580_v23  ;;  %v590_v48 = vmax.f32 %v438_v40, 0.0  ;;  %v461_v30 = vld [vmem:[%s3536_s9 + $0x3a8] sm:$0xff] }
 0x108   : > { %2128 = vmatmul.mubr.bf16.gmra.mxu1 %v1143_v36  ;;  %v888_v47 = vmul.f32 %v3559_v55, %v735_v39  ;;  %v734_v49 = vmin.f32 %v430_v35, 0.0  ;;  %v1150_v51 = vpack.c.bf16 %v1046_v41, %v1038_v37  ;;  %v1045_v52 = vadd.f32 %v893_v43, %v588_v24  ;;  %v469_v35 = vld [vmem:[%s3536_s9 + $0x3e8] sm:$0xff] }
 0x109   : > { %v896_v53 = vmul.f32 %v3559_v55, %v743_v44  ;;  %v742_v54 = vmin.f32 %v438_v40, 0.0  ;;  %v597_v58 = vmax.f32 %v445_v50, 0.0  ;;  %v605_v59 = vmax.f32 %v453_v56, 0.0  ;;  %v460_v40 = vld [vmem:[%s3536_s9 + $0x3a0] sm:$0xff] }
 0x10a   : > { %v1040_v42 = vadd.f32 %v888_v47, %v583_v33  ;;  %v887_v57 = vmul.f32 %v3559_v55, %v734_v49  ;;  %2023 = vmatprep.mubr.bf16.mxu0 %v1150_v51  ;;  %v1149_v61 = vpack.c.bf16 %v1045_v52, %v1037_v46  ;;  %v749_v0 = vmin.f32 %v445_v50, 0.0  ;;  %v468_v46 = vld [vmem:[%s3536_s9 + $0x3e0] sm:$0xff]  ;;  %v463_v51 = vld [vmem:[%s3536_s9 + $0x3b8] sm:$0xff] }
 0x10b   : > { %v1048_v62 = vadd.f32 %v896_v53, %v591_v34  ;;  %v895_v63 = vmul.f32 %v3559_v55, %v742_v54  ;;  %v757_v3 = vmin.f32 %v453_v56, 0.0  ;;  %v596_v4 = vmax.f32 %v444_v60, 0.0 }
 0x10c   : > { %v1039_v2 = vadd.f32 %v887_v57, %v582_v45  ;;  %v604_v5 = vmax.f32 %v452_v1, 0.0  ;;  %2024 = vmatmul.mubr.bf16.gmra.mxu0 %v1149_v61  ;;  %v902_v9 = vmul.f32 %v3559_v55, %v749_v0  ;;  %v748_v10 = vmin.f32 %v444_v60, 0.0  ;;  %v462_v61 = vld [vmem:[%s3536_s9 + $0x3b0] sm:$0xff] }
 0x10d   : > { %v1152_v7 = vpack.c.bf16 %v1048_v62, %v1040_v42  ;;  %v1047_v8 = vadd.f32 %v895_v63, %v590_v48  ;;  %v910_v12 = vmul.f32 %v3559_v55, %v757_v3  ;;  %v756_v13 = vmin.f32 %v452_v1, 0.0  ;;  %v471_v42 = vld [vmem:[%s3536_s9 + $0x3f8] sm:$0xff] }
 0x10e   : > { %v599_v14 = vmax.f32 %v447_v6, 0.0  ;;  %v607_v15 = vmax.f32 %v455_v11, 0.0  ;;  %v1054_v18 = vadd.f32 %v902_v9, %v597_v58  ;;  %v901_v19 = vmul.f32 %v3559_v55, %v748_v10 }
 0x10f   : > { %2669 = vmatprep.mubr.msk.bf16.mxu1 %vm1692_vm1, %v1152_v7  ;;  %v1151_v17 = vpack.c.bf16 %v1047_v8, %v1039_v2  ;;  %v751_v20 = vmin.f32 %v447_v6, 0.0  ;;  %v1062_v22 = vadd.f32 %v910_v12, %v605_v59  ;;  %v909_v23 = vmul.f32 %v3559_v55, %v756_v13  ;;  %v470_v2 = vld [vmem:[%s3536_s9 + $0x3f0] sm:$0xff] }
 0x110   : > { %v759_v24 = vmin.f32 %v455_v11, 0.0  ;;  %v598_v25 = vmax.f32 %v446_v16, 0.0  ;;  %v1053_v26 = vadd.f32 %v901_v19, %v596_v4  ;;  %v606_v28 = vmax.f32 %v454_v21, 0.0  ;;  %v477_v11 = vld [vmem:[%s3536_s9 + $0x428] sm:$0xff] }
 0x111   : > { %2136 = vmatmul.mubr.bf16.gmra.mxu1 %v1151_v17  ;;  %v904_v27 = vmul.f32 %v3559_v55, %v751_v20  ;;  %v750_v29 = vmin.f32 %v446_v16, 0.0  ;;  %v1158_v31 = vpack.c.bf16 %v1062_v22, %v1054_v18  ;;  %v1061_v32 = vadd.f32 %v909_v23, %v604_v5  ;;  %v485_v16 = vld [vmem:[%s3536_s9 + $0x468] sm:$0xff] }
 0x112   : > { %v912_v33 = vmul.f32 %v3559_v55, %v759_v24  ;;  %v758_v34 = vmin.f32 %v454_v21, 0.0  ;;  %v613_v38 = vmax.f32 %v461_v30, 0.0  ;;  %v621_v39 = vmax.f32 %v469_v35, 0.0  ;;  %v476_v21 = vld [vmem:[%s3536_s9 + $0x420] sm:$0xff] }
 0x113   : > { %v1056_v36 = vadd.f32 %v904_v27, %v599_v14  ;;  %v903_v37 = vmul.f32 %v3559_v55, %v750_v29  ;;  %2031 = vmatprep.mubr.bf16.mxu0 %v1158_v31  ;;  %v1157_v41 = vpack.c.bf16 %v1061_v32, %v1053_v26  ;;  %v765_v45 = vmin.f32 %v461_v30, 0.0  ;;  %v484_v26 = vld [vmem:[%s3536_s9 + $0x460] sm:$0xff]  ;;  %v479_v31 = vld [vmem:[%s3536_s9 + $0x438] sm:$0xff] }
 0x114   : > { %v1064_v43 = vadd.f32 %v912_v33, %v607_v15  ;;  %v911_v44 = vmul.f32 %v3559_v55, %v758_v34  ;;  %v773_v48 = vmin.f32 %v469_v35, 0.0  ;;  %v612_v49 = vmax.f32 %v460_v40, 0.0 }
 0x115   : > { %v1055_v47 = vadd.f32 %v903_v37, %v598_v25  ;;  %v620_v50 = vmax.f32 %v468_v46, 0.0  ;;  %2032 = vmatmul.mubr.bf16.gmra.mxu0 %v1157_v41  ;;  %v918_v54 = vmul.f32 %v3559_v55, %v765_v45  ;;  %v764_v56 = vmin.f32 %v460_v40, 0.0  ;;  %v3145_v37 = vld [vmem:[#allocation9 + $0x38] sm:$0xff]  }
 0x116   : > { %v1160_v52 = vpack.c.bf16 %v1064_v43, %v1056_v36  ;;  %v1063_v53 = vadd.f32 %v911_v44, %v606_v28  ;;  %v926_v57 = vmul.f32 %v3559_v55, %v773_v48  ;;  %v772_v58 = vmin.f32 %v468_v46, 0.0  ;;  %v487_v36 = vld [vmem:[%s3536_s9 + $0x478] sm:$0xff]  ;;  %v478_v43 = vld [vmem:[%s3536_s9 + $0x430] sm:$0xff]  ;;  %2934 = vmatprep.subr.bf16.mxu0 %v3145_v37  ;;  %2970 = vmatprep.subr.bf16.mxu1 %v3145_v37 }
 0x117   : > { %v615_v59 = vmax.f32 %v463_v51, 0.0  ;;  %v623_v60 = vmax.f32 %v471_v42, 0.0  ;;  %v1070_v63 = vadd.f32 %v918_v54, %v613_v38  ;;  %v917_v0 = vmul.f32 %v3559_v55, %v764_v56  ;;  %v486_v48 = vld [vmem:[%s3536_s9 + $0x470] sm:$0xff]  ;;  %2935 = vmatpush3.bf16.msra.mxu0 %v3145_v37  ;;  %2978 = vmatpush3.bf16.msra.mxu1 %v3145_v37 }
 0x118   : > { %2670 = vmatprep.mubr.msk.bf16.mxu1 %vm1692_vm1, %v1160_v52  ;;  %v1159_v62 = vpack.c.bf16 %v1063_v53, %v1055_v47  ;;  %v767_v1 = vmin.f32 %v463_v51, 0.0  ;;  %v1078_v3 = vadd.f32 %v926_v57, %v621_v39  ;;  %v925_v4 = vmul.f32 %v3559_v55, %v772_v58  ;;  %v493_v53 = vld [vmem:[%s3536_s9 + $0x4a8] sm:$0xff] }
 0x119   : > { %v775_v5 = vmin.f32 %v471_v42, 0.0  ;;  %v614_v6 = vmax.f32 %v462_v61, 0.0  ;;  %v1069_v7 = vadd.f32 %v917_v0, %v612_v49  ;;  %v622_v9 = vmax.f32 %v470_v2, 0.0 }
 0x11a   : > { %2144 = vmatmul.mubr.bf16.gmra.mxu1 %v1159_v62  ;;  %v920_v8 = vmul.f32 %v3559_v55, %v767_v1  ;;  %v766_v10 = vmin.f32 %v462_v61, 0.0  ;;  %v1166_v12 = vpack.c.bf16 %v1078_v3, %v1070_v63  ;;  %v1077_v13 = vadd.f32 %v925_v4, %v620_v50  ;;  %v492_v62 = vld [vmem:[%s3536_s9 + $0x4a0] sm:$0xff]  ;;  %v495_v3 = vld [vmem:[%s3536_s9 + $0x4b8] sm:$0xff] }
 0x11b   : > { %v928_v14 = vmul.f32 %v3559_v55, %v775_v5  ;;  %v774_v15 = vmin.f32 %v470_v2, 0.0  ;;  %v629_v19 = vmax.f32 %v477_v11, 0.0  ;;  %v637_v20 = vmax.f32 %v485_v16, 0.0 }
 0x11c   : > { %v1072_v17 = vadd.f32 %v920_v8, %v615_v59  ;;  %v919_v18 = vmul.f32 %v3559_v55, %v766_v10  ;;  %2039 = vmatprep.mubr.bf16.mxu0 %v1166_v12  ;;  %v1165_v22 = vpack.c.bf16 %v1077_v13, %v1069_v7  ;;  %v781_v25 = vmin.f32 %v477_v11, 0.0  ;;  %v494_v7 = vld [vmem:[%s3536_s9 + $0x4b0] sm:$0xff]  ;;  %v3146_v8 = vld [vmem:[#allocation9 + $0x30] sm:$0xff]  }
 0x11d   : > { %v1080_v23 = vadd.f32 %v928_v14, %v623_v60  ;;  %v927_v24 = vmul.f32 %v3559_v55, %v774_v15  ;;  %v789_v28 = vmin.f32 %v485_v16, 0.0  ;;  %v628_v29 = vmax.f32 %v476_v21, 0.0  ;;  %2936 = vmatprep.subr.bf16.mxu0 %v3146_v8  ;;  %2971 = vmatprep.subr.bf16.mxu1 %v3146_v8 }
 0x11e   : > { %v1071_v27 = vadd.f32 %v919_v18, %v614_v6  ;;  %v636_v30 = vmax.f32 %v484_v26, 0.0  ;;  %2040 = vmatmul.mubr.bf16.gmra.mxu0 %v1165_v22  ;;  %v934_v34 = vmul.f32 %v3559_v55, %v781_v25  ;;  %v780_v35 = vmin.f32 %v476_v21, 0.0  ;;  %2979 = vmatpush3.bf16.msra.mxu1 %v3146_v8 }
 0x11f   : > { %v1168_v32 = vpack.c.bf16 %v1080_v23, %v1072_v17  ;;  %v1079_v33 = vadd.f32 %v927_v24, %v622_v9  ;;  %v942_v38 = vmul.f32 %v3559_v55, %v789_v28  ;;  %v788_v39 = vmin.f32 %v484_v26, 0.0  ;;  %2937 = vmatpush3.bf16.msra.mxu0 %v3146_v8  ;;  %v3147_v26 = vld [vmem:[#allocation9 + $0x28] sm:$0xff]  }
 0x120   : > { %v631_v40 = vmax.f32 %v479_v31, 0.0  ;;  %v639_v41 = vmax.f32 %v487_v36, 0.0  ;;  %v1086_v45 = vadd.f32 %v934_v34, %v629_v19  ;;  %v933_v46 = vmul.f32 %v3559_v55, %v780_v35  ;;  %2938 = vmatprep.subr.bf16.mxu0 %v3147_v26  ;;  %2972 = vmatprep.subr.bf16.mxu1 %v3147_v26  ;;  %v3151_v34 = vld [vmem:[#allocation9 + $0x8] sm:$0xff]   ;;  %v3152_v35 = vld [vmem:[#allocation9] sm:$0xff]  }
 0x121   : > { %2671 = vmatprep.mubr.msk.bf16.mxu1 %vm1692_vm1, %v1168_v32  ;;  %v1167_v44 = vpack.c.bf16 %v1079_v33, %v1071_v27  ;;  %v783_v47 = vmin.f32 %v479_v31, 0.0  ;;  %v1094_v49 = vadd.f32 %v942_v38, %v637_v20  ;;  %v941_v50 = vmul.f32 %v3559_v55, %v788_v39  ;;  %v3148_v31 = vld [vmem:[#allocation9 + $0x20] sm:$0xff]   ;;  %v3150_v33 = vld [vmem:[#allocation9 + $0x10] sm:$0xff]   ;;  %v3882_v38 = vld [vmem:[#allocation8] ss:$0 sm:$0xff] }
 0x122   : > { %v791_v51 = vmin.f32 %v487_v36, 0.0  ;;  %v630_v52 = vmax.f32 %v478_v43, 0.0  ;;  %v1085_v54 = vadd.f32 %v933_v46, %v628_v29  ;;  %v638_v42 = vmax.f32 %v486_v48, 0.0  ;;  %2980 = vmatpush3.bf16.msra.mxu1 %v3147_v26 }
 0x123   : > { %2152 = vmatmul.mubr.bf16.gmra.mxu1 %v1167_v44  ;;  %v936_v56 = vmul.f32 %v3559_v55, %v783_v47  ;;  %v782_v57 = vmin.f32 %v478_v43, 0.0  ;;  %v1174_v58 = vpack.c.bf16 %v1094_v49, %v1086_v45  ;;  %v1093_v59 = vadd.f32 %v941_v50, %v636_v30  ;;  %2939 = vmatpush3.bf16.msra.mxu0 %v3147_v26 }
 0x124   : > { %v944_v60 = vmul.f32 %v3559_v55, %v791_v51  ;;  %v790_v61 = vmin.f32 %v486_v48, 0.0  ;;  %v645_v1 = vmax.f32 %v493_v53, 0.0  ;;  %v797_v2 = vmin.f32 %v493_v53, 0.0  ;;  %2940 = vmatprep.subr.bf16.mxu0 %v3148_v31  ;;  %2973 = vmatprep.subr.bf16.mxu1 %v3148_v31 }
 0x125   : > { %v1088_v63 = vadd.f32 %v936_v56, %v631_v40  ;;  %v935_v0 = vmul.f32 %v3559_v55, %v782_v57  ;;  %2047 = vmatprep.mubr.bf16.mxu0 %v1174_v58  ;;  %v1173_v4 = vpack.c.bf16 %v1093_v59, %v1085_v54  ;;  %v644_v11 = vmax.f32 %v492_v62, 0.0 }
 0x126   : > { %v1096_v5 = vadd.f32 %v944_v60, %v639_v41  ;;  %v943_v6 = vmul.f32 %v3559_v55, %v790_v61  ;;  %v950_v10 = vmul.f32 %v3559_v55, %v797_v2  ;;  %v796_v12 = vmin.f32 %v492_v62, 0.0  ;;  %2981 = vmatpush3.bf16.msra.mxu1 %v3148_v31 }
 0x127   : > { %v1087_v9 = vadd.f32 %v935_v0, %v630_v52  ;;  %2048 = vmatmul.mubr.bf16.gmra.mxu0 %v1173_v4  ;;  %v647_v15 = vmax.f32 %v495_v3, 0.0  ;;  %v799_v16 = vmin.f32 %v495_v3, 0.0  ;;  %v646_v19 = vmax.f32 %v494_v7, 0.0 }
 0x128   : > { %v1176_v13 = vpack.c.bf16 %v1096_v5, %v1088_v63  ;;  %v1095_v14 = vadd.f32 %v943_v6, %v638_v42  ;;  %v1102_v17 = vadd.f32 %v950_v10, %v645_v1  ;;  %v949_v18 = vmul.f32 %v3559_v55, %v796_v12  ;;  %2941 = vmatpush3.bf16.msra.mxu0 %v3148_v31 }
 0x129   : > { %v798_v20 = vmin.f32 %v494_v7, 0.0  ;;  %v952_v22 = vmul.f32 %v3559_v55, %v799_v16 }
 0x12a   : > { %2672 = vmatprep.mubr.msk.bf16.mxu1 %vm1692_vm1, %v1176_v13  ;;  %v1175_v21 = vpack.c.bf16 %v1095_v14, %v1087_v9  ;;  %v1182_v23 = vpack.c.bf16 %v1102_v17, %v1102_v17  ;;  %v1101_v24 = vadd.f32 %v949_v18, %v644_v11 }
 0x12b   : > { %v951_v25 = vmul.f32 %v3559_v55, %v798_v20  ;;  %v1104_v27 = vadd.f32 %v952_v22, %v647_v15  ;;  %v3149_v55 = vld [vmem:[#allocation9 + $0x18] sm:$0xff]  }
 0x12c   : > { %2160 = vmatmul.mubr.bf16.gmra.mxu1 %v1175_v21  ;;  %2055 = vmatprep.mubr.bf16.mxu0 %v1182_v23  ;;  %v1181_v28 = vpack.c.bf16 %v1101_v24, %v1101_v24 }
 0x12d   : > { %v1103_v29 = vadd.f32 %v951_v25, %v646_v19  ;;  %v1184_v30 = vpack.c.bf16 %v1104_v27, %v1104_v27  ;;  %2942 = vmatprep.subr.bf16.mxu0 %v3149_v55  ;;  %2974 = vmatprep.subr.bf16.mxu1 %v3149_v55 }
 0x12e   : > { %2943 = vmatpush3.bf16.msra.mxu0 %v3149_v55  ;;  %2982 = vmatpush3.bf16.msra.mxu1 %v3149_v55 }
 0x12f   : > { %2056 = vmatmul.mubr.bf16.gmra.mxu0 %v1181_v28  ;;  %2673 = vmatprep.mubr.msk.bf16.mxu1 %vm1692_vm1, %v1184_v30  ;;  %v1183_v32 = vpack.c.bf16 %v1103_v29, %v1103_v29 }
 0x130   : > { %2944 = vmatprep.subr.bf16.mxu0 %v3150_v33  ;;  %2975 = vmatprep.subr.bf16.mxu1 %v3150_v33 }
 0x132   : > { %2945 = vmatpush3.bf16.msra.mxu0 %v3150_v33  ;;  %2983 = vmatpush3.bf16.msra.mxu1 %v3150_v33 }
 0x133   : > { %2946 = vmatprep.subr.bf16.mxu0 %v3151_v34  ;;  %2976 = vmatprep.subr.bf16.mxu1 %v3151_v34 }
 0x134   : > { %2168 = vmatmul.mubr.bf16.gmra.mxu1 %v1183_v32 }
 0x136   : > { %2947 = vmatpush3.bf16.msra.mxu0 %v3151_v34  ;;  %2984 = vmatpush3.bf16.msra.mxu1 %v3151_v34 }
 0x137   : > { %2948 = vmatprep.subr.bf16.mxu0 %v3152_v35  ;;  %2977 = vmatprep.subr.bf16.mxu1 %v3152_v35 }
 0x13a   : > { %2949 = vmatpush3.bf16.msra.mxu0 %v3152_v35  ;;  %2985 = vmatpush3.bf16.msra.mxu1 %v3152_v35 }
 0x153   : > { %v2704_v36 = vpop.f32.mrf.mxu0 }
 0x155   : > { %v2780_v37 = vpop.f32.mrf.mxu1  ;;  %v2705_v39 = vpop.f32.mrf.mxu0 }
 0x156   : > { %v2706_v40 = vadd.f32 %v2705_v39, %v2704_v36 }
 0x157   : > { %v2781_v41 = vpop.f32.mrf.mxu1  ;;  %v2707_v44 = vpop.f32.mrf.mxu0 }
 0x158   : > { %v2782_v43 = vadd.f32 %v2781_v41, %v2780_v37  ;;  %v1762_v45 = vadd.f32 %v2706_v40, %v3882_v38 }
 0x159   : > { %v2783_v46 = vpop.f32.mrf.mxu1  ;;  %v2708_v47 = vpop.f32.mrf.mxu0 }
 0x15a   : > { %v3885_v48 = vadd.f32 %v2782_v43, %v1762_v45  ;;  %v2709_v49 = vadd.f32 %v2708_v47, %v2707_v44 }
 0x15b   : > { %v2784_v50 = vpop.f32.mrf.mxu1  ;;  %v2710_v52 = vpop.f32.mrf.mxu0 }
 0x15c   : > { %v2785_v51 = vadd.f32 %v2784_v50, %v2783_v46  ;;  %v1765_v53 = vadd.f32 %v2709_v49, %v3882_v38 }
 0x15d   : > { %v2711_v54 = vpop.f32.mrf.mxu0  ;;  %v2786_v57 = vpop.f32.mrf.mxu1 }
 0x15e   : > { %v3888_v56 = vadd.f32 %v2785_v51, %v1765_v53  ;;  %v2712_v42 = vadd.f32 %v2711_v54, %v2710_v52 }
 0x15f   : > { %v2713_v58 = vpop.f32.mrf.mxu0  ;;  %v2787_v60 = vpop.f32.mrf.mxu1 }
 0x160   : > { %v1770_v59 = vadd.f32 %v2712_v42, %v3882_v38  ;;  %v2788_v62 = vadd.f32 %v2787_v60, %v2786_v57 }
 0x161   : > { %v2714_v61 = vpop.f32.mrf.mxu0  ;;  %v2789_v0 = vpop.f32.mrf.mxu1 }
 0x162   : > { %v2715_v63 = vadd.f32 %v2714_v61, %v2713_v58  ;;  %v3891_v1 = vadd.f32 %v2788_v62, %v1770_v59 }
 0x163   : > { %v2716_v3 = vpop.f32.mrf.mxu0  ;;  %v2790_v4 = vpop.f32.mrf.mxu1 }
 0x164   : > { %v1773_v2 = vadd.f32 %v2715_v63, %v3882_v38  ;;  %v2791_v5 = vadd.f32 %v2790_v4, %v2789_v0 }
 0x165   : > { %v2717_v6 = vpop.f32.mrf.mxu0  ;;  %v2792_v9 = vpop.f32.mrf.mxu1 }
 0x166   : > { %v2718_v7 = vadd.f32 %v2717_v6, %v2716_v3  ;;  %v3894_v8 = vadd.f32 %v2791_v5, %v1773_v2 }
 0x167   : > { %v2719_v10 = vpop.f32.mrf.mxu0  ;;  %v2793_v12 = vpop.f32.mrf.mxu1 }
 0x168   : > { %v1778_v11 = vadd.f32 %v2718_v7, %v3882_v38  ;;  %v2794_v14 = vadd.f32 %v2793_v12, %v2792_v9 }
 0x169   : > { %v2720_v13 = vpop.f32.mrf.mxu0  ;;  %v2795_v16 = vpop.f32.mrf.mxu1 }
 0x16a   : > { %v2721_v15 = vadd.f32 %v2720_v13, %v2719_v10  ;;  %v3897_v17 = vadd.f32 %v2794_v14, %v1778_v11 }
 0x16b   : > { %v2722_v19 = vpop.f32.mrf.mxu0  ;;  %v2796_v20 = vpop.f32.mrf.mxu1 }
 0x16c   : > { %v1781_v18 = vadd.f32 %v2721_v15, %v3882_v38  ;;  %v2797_v21 = vadd.f32 %v2796_v20, %v2795_v16 }
 0x16d   : > { %v2723_v22 = vpop.f32.mrf.mxu0  ;;  %v2798_v25 = vpop.f32.mrf.mxu1 }
 0x16e   : > { %v2724_v23 = vadd.f32 %v2723_v22, %v2722_v19  ;;  %v3900_v24 = vadd.f32 %v2797_v21, %v1781_v18 }
 0x16f   : > { %v2725_v26 = vpop.f32.mrf.mxu0  ;;  %v2799_v28 = vpop.f32.mrf.mxu1 }
 0x170   : > { %v1786_v27 = vadd.f32 %v2724_v23, %v3882_v38  ;;  %v2800_v30 = vadd.f32 %v2799_v28, %v2798_v25 }
 0x171   : > { %v2726_v29 = vpop.f32.mrf.mxu0  ;;  %v2801_v32 = vpop.f32.mrf.mxu1 }
 0x172   : > { %v2727_v31 = vadd.f32 %v2726_v29, %v2725_v26  ;;  %v3903_v55 = vadd.f32 %v2800_v30, %v1786_v27 }
 0x173   : > { %v2728_v34 = vpop.f32.mrf.mxu0  ;;  %v2802_v35 = vpop.f32.mrf.mxu1 }
 0x174   : > { %v1789_v33 = vadd.f32 %v2727_v31, %v3882_v38  ;;  %v2803_v36 = vadd.f32 %v2802_v35, %v2801_v32 }
 0x175   : > { %v2729_v37 = vpop.f32.mrf.mxu0  ;;  %v2804_v41 = vpop.f32.mrf.mxu1 }
 0x176   : > { %v2730_v39 = vadd.f32 %v2729_v37, %v2728_v34  ;;  %v3906_v40 = vadd.f32 %v2803_v36, %v1789_v33 }
 0x177   : > { %v2731_v43 = vpop.f32.mrf.mxu0  ;;  %v2805_v45 = vpop.f32.mrf.mxu1 }
 0x178   : > { %v1794_v44 = vadd.f32 %v2730_v39, %v3882_v38  ;;  %v2806_v47 = vadd.f32 %v2805_v45, %v2804_v41 }
 0x179   : > { %v2732_v46 = vpop.f32.mrf.mxu0  ;;  %v2807_v50 = vpop.f32.mrf.mxu1 }
 0x17a   : > { %v2733_v49 = vadd.f32 %v2732_v46, %v2731_v43  ;;  %v3909_v51 = vadd.f32 %v2806_v47, %v1794_v44 }
 0x17b   : > { %v2734_v53 = vpop.f32.mrf.mxu0  ;;  %v2808_v54 = vpop.f32.mrf.mxu1 }
 0x17c   : > { %v1797_v52 = vadd.f32 %v2733_v49, %v3882_v38  ;;  %v2809_v42 = vadd.f32 %v2808_v54, %v2807_v50 }
 0x17d   : > { %v2735_v57 = vpop.f32.mrf.mxu0  ;;  %v2810_v60 = vpop.f32.mrf.mxu1 }
 0x17e   : > { %v2736_v58 = vadd.f32 %v2735_v57, %v2734_v53  ;;  %v3912_v59 = vadd.f32 %v2809_v42, %v1797_v52 }
 0x17f   : > { %v2737_v61 = vpop.f32.mrf.mxu0  ;;  %v2811_v63 = vpop.f32.mrf.mxu1 }
 0x180   : > { %v1802_v62 = vadd.f32 %v2736_v58, %v3882_v38  ;;  %v2812_v2 = vadd.f32 %v2811_v63, %v2810_v60 }
 0x181   : > { %v2738_v0 = vpop.f32.mrf.mxu0  ;;  %v2813_v4 = vpop.f32.mrf.mxu1 }
 0x182   : > { %v2739_v3 = vadd.f32 %v2738_v0, %v2737_v61  ;;  %v3915_v5 = vadd.f32 %v2812_v2, %v1802_v62 }
 0x183   : > { %v2740_v7 = vpop.f32.mrf.mxu0  ;;  %v2814_v9 = vpop.f32.mrf.mxu1 }
 0x184   : > { %v1805_v6 = vadd.f32 %v2739_v3, %v3882_v38  ;;  %v2815_v10 = vadd.f32 %v2814_v9, %v2813_v4 }
 0x185   : > { %v2741_v11 = vpop.f32.mrf.mxu0  ;;  %v2816_v14 = vpop.f32.mrf.mxu1 }
 0x186   : > { %v2742_v12 = vadd.f32 %v2741_v11, %v2740_v7  ;;  %v3918_v13 = vadd.f32 %v2815_v10, %v1805_v6 }
 0x187   : > { %v2743_v15 = vpop.f32.mrf.mxu0  ;;  %v2817_v18 = vpop.f32.mrf.mxu1 }
 0x188   : > { %v1810_v16 = vadd.f32 %v2742_v12, %v3882_v38  ;;  %v2818_v20 = vadd.f32 %v2817_v18, %v2816_v14 }
 0x189   : > { %v2744_v19 = vpop.f32.mrf.mxu0  ;;  %v2819_v22 = vpop.f32.mrf.mxu1 }
 0x18a   : > { %v2745_v21 = vadd.f32 %v2744_v19, %v2743_v15  ;;  %v3921_v23 = vadd.f32 %v2818_v20, %v1810_v16 }
 0x18b   : > { %v2746_v26 = vpop.f32.mrf.mxu0  ;;  %v2820_v27 = vpop.f32.mrf.mxu1 }
 0x18c   : > { %v1813_v25 = vadd.f32 %v2745_v21, %v3882_v38  ;;  %v2821_v28 = vadd.f32 %v2820_v27, %v2819_v22 }
 0x18d   : > { %v2747_v29 = vpop.f32.mrf.mxu0  ;;  %v2822_v32 = vpop.f32.mrf.mxu1 }
 0x18e   : > { %v2748_v30 = vadd.f32 %v2747_v29, %v2746_v26  ;;  %v3924_v31 = vadd.f32 %v2821_v28, %v1813_v25 }
 0x18f   : > { %v2749_v33 = vpop.f32.mrf.mxu0  ;;  %v2823_v35 = vpop.f32.mrf.mxu1 }
 0x190   : > { %v1818_v34 = vadd.f32 %v2748_v30, %v3882_v38  ;;  %v2824_v37 = vadd.f32 %v2823_v35, %v2822_v32 }
 0x191   : > { %v2750_v36 = vpop.f32.mrf.mxu0  ;;  %v2825_v41 = vpop.f32.mrf.mxu1 }
 0x192   : > { %v2751_v39 = vadd.f32 %v2750_v36, %v2749_v33  ;;  %v3927_v43 = vadd.f32 %v2824_v37, %v1818_v34 }
 0x193   : > { %v2752_v45 = vpop.f32.mrf.mxu0  ;;  %v2826_v46 = vpop.f32.mrf.mxu1 }
 0x194   : > { %v1821_v44 = vadd.f32 %v2751_v39, %v3882_v38  ;;  %v2827_v47 = vadd.f32 %v2826_v46, %v2825_v41  ;;  %v3943_v41 = vstv %s2599_s29 }
 0x195   : > { %v2753_v49 = vpop.f32.mrf.mxu0 }
 0x196   : > { %v2754_v50 = vadd.f32 %v2753_v49, %v2752_v45  ;;  %v3930_v52 = vadd.f32 %v2827_v47, %v1821_v44  ;;  %v2828_v53 = vpop.f32.mrf.mxu1 }
 0x197   : > { %v2755_v54 = vpop.f32.mrf.mxu0 }
 0x198   : > { %v1826_v42 = vadd.f32 %v2754_v50, %v3882_v38  ;;  %v2829_v57 = vpop.f32.mrf.mxu1 }
 0x199   : > { %v2756_v58 = vpop.f32.mrf.mxu0  ;;  %v2830_v60 = vadd.f32 %v2829_v57, %v2828_v53 }
 0x19a   : > { %v2757_v61 = vadd.f32 %v2756_v58, %v2755_v54  ;;  %v2831_v62 = vpop.f32.mrf.mxu1 }
 0x19b   : > { %v2758_v63 = vpop.f32.mrf.mxu0  ;;  %v3933_v0 = vadd.f32 %v2830_v60, %v1826_v42 }
 0x19c   : > { %v1829_v2 = vadd.f32 %v2757_v61, %v3882_v38  ;;  %v2832_v3 = vpop.f32.mrf.mxu1 }
 0x19d   : > { %v2759_v4 = vpop.f32.mrf.mxu0  ;;  %v2833_v6 = vadd.f32 %v2832_v3, %v2831_v62 }
 0x19e   : > { %v2760_v7 = vadd.f32 %v2759_v4, %v2758_v63  ;;  %v2834_v9 = vpop.f32.mrf.mxu1 }
 0x19f   : > { %v2761_v10 = vpop.f32.mrf.mxu0  ;;  %v3936_v11 = vadd.f32 %v2833_v6, %v1829_v2 }
 0x1a0   : > { %v1834_v12 = vadd.f32 %v2760_v7, %v3882_v38  ;;  %v2835_v14 = vpop.f32.mrf.mxu1 }
 0x1a1   : > { %v2762_v15 = vpop.f32.mrf.mxu0  ;;  %v2836_v16 = vadd.f32 %v2835_v14, %v2834_v9 }
 0x1a2   : > { %v2837_v18 = vpop.f32.mrf.mxu1 }
 0x1a3   : > { %v2856_v19 = vpop.f32.mrf.mxu0  ;;  %v3939_v20 = vadd.f32 %v2836_v16, %v1834_v12 }
 0x1a4   : > { %v2838_v21 = vpop.f32.mrf.mxu1 }
 0x1a5   : > { %v2857_v22 = vpop.f32.mrf.mxu0 }
 0x1a6   : > { %v2858_v25 = vadd.f32 %v2857_v22, %v2856_v19  ;;  %v2097_v26 = vpop.f32.mrf.mxu1 }
 0x1a7   : > { %v2859_v27 = vpop.f32.mrf.mxu0 }
 0x1a8   : > { %v1986_v28 = vadd.f32 %v2858_v25, %v3885_v48  ;;  %v2099_v29 = vpop.f32.mrf.mxu1 }
 0x1a9   : > { %v2860_v30 = vpop.f32.mrf.mxu0 }
 0x1aa   : > { %v2098_v32 = vadd.f32 %v2097_v26, %v1986_v28  ;;  %v2861_v33 = vadd.f32 %v2860_v30, %v2859_v27  ;;  %v2100_v38 = vpop.f32.mrf.mxu1 }
 0x1ab   : > { %v2862_v34 = vpop.f32.mrf.mxu0 }
 0x1ac   : > { %v2194_v35 = vmin.f32 %v2098_v32, 0.0  ;;  %v1989_v36 = vadd.f32 %v2861_v33, %v3888_v56  ;;  %v2102_v37 = vpop.f32.mrf.mxu1  ;;  %v2175_v53 = vmax.f32 %v2098_v32, 0.0 }
 0x1ad   : > { %v2863_v39 = vpop.f32.mrf.mxu0 }
 0x1ae   : > { %v2101_v44 = vadd.f32 %v2100_v38, %v1989_v36  ;;  %v2864_v45 = vadd.f32 %v2863_v39, %v2862_v34  ;;  %v2105_v46 = vpop.f32.mrf.mxu1  ;;  %v2214_v50 = vmul.f32 %v3943_v41, %v2194_v35 }
 0x1af   : > { %v2865_v47 = vpop.f32.mrf.mxu0 }
 0x1b0   : > { %v2195_v49 = vmin.f32 %v2101_v44, 0.0  ;;  %v1994_v48 = vadd.f32 %v2864_v45, %v3891_v1  ;;  %v2107_v54 = vpop.f32.mrf.mxu1  ;;  %v2176_v57 = vmax.f32 %v2101_v44, 0.0  ;;  %v2233_v3 = vadd.f32 %v2214_v50, %v2175_v53 }
 0x1b1   : > { %v2866_v42 = vpop.f32.mrf.mxu0 }
 0x1b2   : > { %v2106_v58 = vadd.f32 %v2105_v46, %v1994_v48  ;;  %v2867_v60 = vadd.f32 %v2866_v42, %v2865_v47  ;;  %v2215_v56 = vmul.f32 %v3943_v41, %v2195_v49  ;;  %v2108_v61 = vpop.f32.mrf.mxu1 }
 0x1b3   : > { %v2868_v62 = vpop.f32.mrf.mxu0 }
 0x1b4   : > { %v2196_v63 = vmin.f32 %v2106_v58, 0.0  ;;  %v1997_v2 = vadd.f32 %v2867_v60, %v3894_v8  ;;  %v2234_v4 = vadd.f32 %v2215_v56, %v2176_v57  ;;  %v2110_v6 = vpop.f32.mrf.mxu1  ;;  %v2177_v19 = vmax.f32 %v2106_v58, 0.0 }
 0x1b5   : > { %v2869_v7 = vpop.f32.mrf.mxu0 }
 0x1b6   : > { %v2109_v1 = vadd.f32 %v2108_v61, %v1997_v2  ;;  %v2870_v9 = vadd.f32 %v2869_v7, %v2868_v62  ;;  %v2252_v10 = vpack.c.bf16 %v2234_v4, %v2233_v3  ;;  %v2113_v12 = vpop.f32.mrf.mxu1  ;;  %v2216_v15 = vmul.f32 %v3943_v41, %v2196_v63 }
 0x1b7   : > { %v2871_v14 = vpop.f32.mrf.mxu0 }
 0x1b8   : > { %v2197_v16 = vmin.f32 %v2109_v1, 0.0  ;;  %v2002_v18 = vadd.f32 %v2870_v9, %v3897_v17  ;;  %2950 = vmatprep.mubr.bf16.mxu0 %v2252_v10  ;;  %v2115_v21 = vpop.f32.mrf.mxu1  ;;  %v2178_v25 = vmax.f32 %v2109_v1, 0.0  ;;  %v2235_v29 = vadd.f32 %v2216_v15, %v2177_v19 }
 0x1b9   : > { %v2872_v22 = vpop.f32.mrf.mxu0 }
 0x1ba   : > { %v2217_v8 = vmul.f32 %v3943_v41, %v2197_v16  ;;  %v2114_v26 = vadd.f32 %v2113_v12, %v2002_v18  ;;  %v2873_v27 = vadd.f32 %v2872_v22, %v2871_v14  ;;  %v2116_v28 = vpop.f32.mrf.mxu1 }
 0x1bb   : > { %v2874_v38 = vpop.f32.mrf.mxu0 }
 0x1bc   : > { %v2236_v30 = vadd.f32 %v2217_v8, %v2178_v25  ;;  %v2198_v32 = vmin.f32 %v2114_v26, 0.0  ;;  %v2005_v33 = vadd.f32 %v2873_v27, %v3900_v24  ;;  %v2118_v34 = vpop.f32.mrf.mxu1  ;;  %v2179_v49 = vmax.f32 %v2114_v26, 0.0 }
 0x1bd   : > { %v2875_v17 = vpop.f32.mrf.mxu0 }
 0x1be   : > { %v2253_v35 = vpack.c.bf16 %v2236_v30, %v2235_v29  ;;  %v2117_v36 = vadd.f32 %v2116_v28, %v2005_v33  ;;  %v2876_v37 = vadd.f32 %v2875_v17, %v2874_v38  ;;  %v2218_v46 = vmul.f32 %v3943_v41, %v2198_v32 }
 0x1bf   : > { %v2121_v44 = vpop.f32.mrf.mxu1  ;;  %v2877_v45 = vpop.f32.mrf.mxu0 }
 0x1c0   : > { %v2199_v39 = vmin.f32 %v2117_v36, 0.0  ;;  %2951 = vmatmul.mubr.bf16.vlgmr.msra.gmra.mxu0 %v2253_v35  ;;  %v2010_v47 = vadd.f32 %v2876_v37, %v3903_v55  ;;  %v2180_v48 = vmax.f32 %v2117_v36, 0.0  ;;  %v2237_v58 = vadd.f32 %v2218_v46, %v2179_v49 }
 0x1c1   : > { %v2123_v50 = vpop.f32.mrf.mxu1  ;;  %v2878_v53 = vpop.f32.mrf.mxu0 }
 0x1c2   : > { %v2219_v24 = vmul.f32 %v3943_v41, %v2199_v39  ;;  %v2122_v54 = vadd.f32 %v2121_v44, %v2010_v47  ;;  %v2879_v42 = vadd.f32 %v2878_v53, %v2877_v45 }
 0x1c3   : > { %v2124_v57 = vpop.f32.mrf.mxu1  ;;  %v2880_v62 = vpop.f32.mrf.mxu0 }
 0x1c4   : > { %v2238_v60 = vadd.f32 %v2219_v24, %v2180_v48  ;;  %v2200_v56 = vmin.f32 %v2122_v54, 0.0  ;;  %v2013_v61 = vadd.f32 %v2879_v42, %v3906_v40  ;;  %v2181_v12 = vmax.f32 %v2122_v54, 0.0 }
 0x1c5   : > { %v2126_v63 = vpop.f32.mrf.mxu1  ;;  %v2881_v4 = vpop.f32.mrf.mxu0 }
 0x1c6   : > { %v2254_v2 = vpack.c.bf16 %v2238_v60, %v2237_v58  ;;  %v2125_v3 = vadd.f32 %v2124_v57, %v2013_v61  ;;  %v2882_v55 = vadd.f32 %v2881_v4, %v2880_v62  ;;  %v2220_v9 = vmul.f32 %v3943_v41, %v2200_v56 }
 0x1c7   : > { %v2883_v1 = vpop.f32.mrf.mxu0 }
 0x1c8   : > { %2954 = vmatprep.mubr.bf16.mxu0 %v2254_v2  ;;  %v2201_v6 = vmin.f32 %v2125_v3, 0.0  ;;  %v2129_v7 = vpop.f32.mrf.mxu1  ;;  %v2018_v10 = vadd.f32 %v2882_v55, %v3909_v51  ;;  %v2182_v14 = vmax.f32 %v2125_v3, 0.0  ;;  %v2239_v22 = vadd.f32 %v2220_v9, %v2181_v12 }
 0x1c9   : > { %v2884_v16 = vpop.f32.mrf.mxu0 }
 0x1ca   : > { %v2131_v15 = vpop.f32.mrf.mxu1  ;;  %v2221_v40 = vmul.f32 %v3943_v41, %v2201_v6  ;;  %v2130_v18 = vadd.f32 %v2129_v7, %v2018_v10  ;;  %v2885_v19 = vadd.f32 %v2884_v16, %v2883_v1 }
 0x1cc   : > { %v2132_v21 = vpop.f32.mrf.mxu1  ;;  %v2240_v25 = vadd.f32 %v2221_v40, %v2182_v14  ;;  %v2202_v8 = vmin.f32 %v2130_v18, 0.0  ;;  %v2021_v26 = vadd.f32 %v2885_v19, %v3912_v59  ;;  %v2886_v27 = vpop.f32.mrf.mxu0  ;;  %v2183_v17 = vmax.f32 %v2130_v18, 0.0 }
 0x1ce   : > { %v2134_v28 = vpop.f32.mrf.mxu1  ;;  %v2255_v29 = vpack.c.bf16 %v2240_v25, %v2239_v22  ;;  %v2133_v30 = vadd.f32 %v2132_v21, %v2021_v26  ;;  %v2887_v32 = vpop.f32.mrf.mxu0  ;;  %v2222_v35 = vmul.f32 %v3943_v41, %v2202_v8 }
 0x1cf   : > { %v2888_v51 = vadd.f32 %v2887_v32, %v2886_v27 }
 0x1d0   : > { %2955 = vmatmul.mubr.bf16.gmra.mxu0 %v2255_v29  ;;  %v2203_v33 = vmin.f32 %v2133_v30, 0.0  ;;  %v2889_v34 = vpop.f32.mrf.mxu0  ;;  %v2184_v37 = vmax.f32 %v2133_v30, 0.0  ;;  %v2241_v49 = vadd.f32 %v2222_v35, %v2183_v17 }
 0x1d1   : > { %v2137_v38 = vpop.f32.mrf.mxu1  ;;  %v2026_v36 = vadd.f32 %v2888_v51, %v3915_v5 }
 0x1d2   : > { %v2890_v44 = vpop.f32.mrf.mxu0  ;;  %v2223_v59 = vmul.f32 %v3943_v41, %v2203_v33 }
 0x1d3   : > { %v2139_v39 = vpop.f32.mrf.mxu1  ;;  %v2138_v45 = vadd.f32 %v2137_v38, %v2026_v36  ;;  %v2891_v46 = vadd.f32 %v2890_v44, %v2889_v34 }
 0x1d4   : > { %v2242_v48 = vadd.f32 %v2223_v59, %v2184_v37 }
 0x1d5   : > { %v2140_v47 = vpop.f32.mrf.mxu1  ;;  %v2204_v50 = vmin.f32 %v2138_v45, 0.0  ;;  %v2029_v53 = vadd.f32 %v2891_v46, %v3918_v13  ;;  %v2892_v24 = vpop.f32.mrf.mxu0  ;;  %v2185_v2 = vmax.f32 %v2138_v45, 0.0 }
 0x1d6   : > { %v2256_v42 = vpack.c.bf16 %v2242_v48, %v2241_v49 }
 0x1d7   : > { %v2142_v54 = vpop.f32.mrf.mxu1  ;;  %v2141_v57 = vadd.f32 %v2140_v47, %v2029_v53  ;;  %v2893_v58 = vpop.f32.mrf.mxu0  ;;  %v2224_v62 = vmul.f32 %v3943_v41, %v2204_v50 }
 0x1d8   : > { %v2894_v5 = vadd.f32 %v2893_v58, %v2892_v24  ;;  %2958 = vmatprep.mubr.bf16.mxu0 %v2256_v42 }
 0x1d9   : > { %v2205_v60 = vmin.f32 %v2141_v57, 0.0  ;;  %v2895_v61 = vpop.f32.mrf.mxu0  ;;  %v2186_v3 = vmax.f32 %v2141_v57, 0.0  ;;  %v2243_v9 = vadd.f32 %v2224_v62, %v2185_v2 }
 0x1da   : > { %v2145_v56 = vpop.f32.mrf.mxu1  ;;  %v2034_v63 = vadd.f32 %v2894_v5, %v3921_v23 }
 0x1db   : > { %v2896_v55 = vpop.f32.mrf.mxu0  ;;  %v2225_v13 = vmul.f32 %v3943_v41, %v2205_v60 }
 0x1dc   : > { %v2147_v4 = vpop.f32.mrf.mxu1  ;;  %v2146_v6 = vadd.f32 %v2145_v56, %v2034_v63  ;;  %v2897_v7 = vadd.f32 %v2896_v55, %v2895_v61 }
 0x1dd   : > { %v2244_v10 = vadd.f32 %v2225_v13, %v2186_v3 }
 0x1de   : > { %v2148_v1 = vpop.f32.mrf.mxu1  ;;  %v2206_v12 = vmin.f32 %v2146_v6, 0.0  ;;  %v2037_v14 = vadd.f32 %v2897_v7, %v3924_v31  ;;  %v2898_v15 = vpop.f32.mrf.mxu0  ;;  %v2187_v27 = vmax.f32 %v2146_v6, 0.0 }
 0x1df   : > { %v2257_v40 = vpack.c.bf16 %v2244_v10, %v2243_v9 }
 0x1e0   : > { %v2150_v16 = vpop.f32.mrf.mxu1  ;;  %v2149_v18 = vadd.f32 %v2148_v1, %v2037_v14  ;;  %v2899_v19 = vpop.f32.mrf.mxu0  ;;  %v2226_v8 = vmul.f32 %v3943_v41, %v2206_v12 }
 0x1e1   : > { %v2900_v23 = vadd.f32 %v2899_v19, %v2898_v15  ;;  %2959 = vmatmul.mubr.bf16.gmra.mxu0 %v2257_v40 }
 0x1e2   : > { %v2207_v21 = vmin.f32 %v2149_v18, 0.0  ;;  %v2901_v25 = vpop.f32.mrf.mxu0  ;;  %v2188_v28 = vmax.f32 %v2149_v18, 0.0  ;;  %v2245_v38 = vadd.f32 %v2226_v8, %v2187_v27 }
 0x1e3   : > { %v2153_v22 = vpop.f32.mrf.mxu1  ;;  %v2042_v26 = vadd.f32 %v2900_v23, %v3927_v43 }
 0x1e4   : > { %v2902_v30 = vpop.f32.mrf.mxu0  ;;  %v2227_v31 = vmul.f32 %v3943_v41, %v2207_v21 }
 0x1e5   : > { %v2155_v29 = vpop.f32.mrf.mxu1  ;;  %v2154_v32 = vadd.f32 %v2153_v22, %v2042_v26  ;;  %v2903_v51 = vadd.f32 %v2902_v30, %v2901_v25  ;;  %v2674_v26 = vld [vmem:[#allocation11] ss:$0 sm:$0xff] }
 0x1e6   : > { %v2246_v34 = vadd.f32 %v2227_v31, %v2188_v28 }
 0x1e7   : > { %v2156_v33 = vpop.f32.mrf.mxu1  ;;  %v2208_v35 = vmin.f32 %v2154_v32, 0.0  ;;  %v2045_v36 = vadd.f32 %v2903_v51, %v3930_v52  ;;  %v2904_v17 = vpop.f32.mrf.mxu0  ;;  %v2189_v50 = vmax.f32 %v2154_v32, 0.0 }
 0x1e8   : > { %v2258_v39 = vpack.c.bf16 %v2246_v34, %v2245_v38 }
 0x1e9   : > { %v2158_v37 = vpop.f32.mrf.mxu1  ;;  %v2157_v44 = vadd.f32 %v2156_v33, %v2045_v36  ;;  %v2905_v59 = vpop.f32.mrf.mxu0  ;;  %v2228_v45 = vmul.f32 %v3943_v41, %v2208_v35 }
 0x1ea   : > { %v2906_v43 = vadd.f32 %v2905_v59, %v2904_v17  ;;  %2962 = vmatprep.mubr.bf16.mxu1 %v2258_v39 }
 0x1eb   : > { %v2209_v46 = vmin.f32 %v2157_v44, 0.0  ;;  %v2907_v49 = vpop.f32.mrf.mxu0  ;;  %v2190_v53 = vmax.f32 %v2157_v44, 0.0  ;;  %v2247_v58 = vadd.f32 %v2228_v45, %v2189_v50 }
 0x1ec   : > { %v2161_v47 = vpop.f32.mrf.mxu1  ;;  %v2050_v48 = vadd.f32 %v2906_v43, %v3933_v0 }
 0x1ed   : > { %v2229_v24 = vmul.f32 %v3943_v41, %v2209_v46  ;;  %v2908_v52 = vpop.f32.mrf.mxu0 }
 0x1ee   : > { %v2163_v54 = vpop.f32.mrf.mxu1  ;;  %v2162_v42 = vadd.f32 %v2161_v47, %v2050_v48  ;;  %v2909_v57 = vadd.f32 %v2908_v52, %v2907_v49 }
 0x1ef   : > { %v2248_v5 = vadd.f32 %v2229_v24, %v2190_v53  ;;  %v2910_v56 = vpop.f32.mrf.mxu0 }
 0x1f0   : > { %v2164_v60 = vpop.f32.mrf.mxu1  ;;  %v2210_v61 = vmin.f32 %v2162_v42, 0.0  ;;  %v2053_v62 = vadd.f32 %v2909_v57, %v3936_v11  ;;  %v2191_v12 = vmax.f32 %v2162_v42, 0.0 }
 0x1f1   : > { %v2259_v63 = vpack.c.bf16 %v2248_v5, %v2247_v58  ;;  %v2911_v3 = vpop.f32.mrf.mxu0 }
 0x1f2   : > { %v2166_v2 = vpop.f32.mrf.mxu1  ;;  %v2165_v4 = vadd.f32 %v2164_v60, %v2053_v62  ;;  %v2912_v0 = vadd.f32 %v2911_v3, %v2910_v56  ;;  %v2230_v1 = vmul.f32 %v3943_v41, %v2210_v61 }
 0x1f3   : > { %v2913_v13 = vpop.f32.mrf.mxu0  ;;  %2963 = vmatmul.mubr.bf16.vlgmr.msra.gmra.mxu1 %v2259_v63 }
 0x1f4   : > { %v2169_v55 = vpop.f32.mrf.mxu1  ;;  %v2211_v6 = vmin.f32 %v2165_v4, 0.0  ;;  %v2058_v7 = vadd.f32 %v2912_v0, %v3939_v20  ;;  %v2192_v14 = vmax.f32 %v2165_v4, 0.0  ;;  %v2249_v18 = vadd.f32 %v2230_v1, %v2191_v12 }
 0x1f5   : > { %v2914_v10 = vpop.f32.mrf.mxu0 }
 0x1f6   : > { %v2171_v9 = vpop.f32.mrf.mxu1  ;;  %v2170_v15 = vadd.f32 %v2169_v55, %v2058_v7  ;;  %v2231_v11 = vmul.f32 %v3943_v41, %v2211_v6 }
 0x1f8   : > { %v2172_v16 = vpop.f32.mrf.mxu1  ;;  %v2212_v40 = vmin.f32 %v2170_v15, 0.0  ;;  %v2250_v19 = vadd.f32 %v2231_v11, %v2192_v14  ;;  %v2193_v22 = vmax.f32 %v2170_v15, 0.0 }
 0x1fa   : > { %v2173_v23 = vpop.f32.mrf.mxu1  ;;  %v2260_v21 = vpack.c.bf16 %v2250_v19, %v2249_v18  ;;  %v2232_v25 = vmul.f32 %v3943_v41, %v2212_v40 }
 0x1fc   : > { %2966 = vmatprep.mubr.bf16.mxu1 %v2260_v21  ;;  %v2251_v20 = vadd.f32 %v2232_v25, %v2193_v22 }
 0x1fe   : > { %v2261_v8 = vpack.c.bf16 %v2251_v20, %v2251_v20 }
 0x200   : > { %2967 = vmatmul.mubr.bf16.gmra.mxu1 %v2261_v8 }
 0x280   : > { %v2952_v41 = vpop.f32.mrf.mxu0 }
 0x281   : > { %v2376_v27 = vadd.f32 %v2952_v41, %v2674_v26 }
 0x282   : > { %v2367_v28 = vpop.f32.mrf.mxu0 }
 0x283   : > { %2447 = vst [vmem:[%s3986_s15 + $0x10] sm:$0xff] %v2376_v27  ;;  %v2368_v29 = vadd.f32 %v2674_v26, %v2367_v28 }
 0x284   : > { %v2953_v30 = vpop.f32.mrf.mxu0 }
 0x285   : > { %2445 = vst [vmem:[%s3986_s15] sm:$0xff] %v2368_v29  ;;  %v2379_v31 = vadd.f32 %v2953_v30, %v2674_v26 }
 0x286   : > { %v2370_v32 = vpop.f32.mrf.mxu0 }
 0x287   : > { %2448 = vst [vmem:[%s3986_s15 + $0x18] sm:$0xff] %v2379_v31  ;;  %v2371_v51 = vadd.f32 %v2674_v26, %v2370_v32 }
 0x289   : > { %2446 = vst [vmem:[%s3986_s15 + $0x8] sm:$0xff] %v2371_v51 }
 0x290   : > { %v2956_v33 = vpop.f32.mrf.mxu0 }
 0x291   : > { %v2392_v38 = vadd.f32 %v2956_v33, %v2674_v26 }
 0x292   : > { %v2383_v34 = vpop.f32.mrf.mxu0 }
 0x293   : > { %2451 = vst [vmem:[%s3986_s15 + $0x30] sm:$0xff] %v2392_v38  ;;  %v2384_v35 = vadd.f32 %v2674_v26, %v2383_v34 }
 0x294   : > { %v2957_v36 = vpop.f32.mrf.mxu0 }
 0x295   : > { %2449 = vst [vmem:[%s3986_s15 + $0x20] sm:$0xff] %v2384_v35  ;;  %v2395_v17 = vadd.f32 %v2957_v36, %v2674_v26 }
 0x296   : > { %v2386_v37 = vpop.f32.mrf.mxu0 }
 0x297   : > { %2452 = vst [vmem:[%s3986_s15 + $0x38] sm:$0xff] %v2395_v17  ;;  %v2387_v39 = vadd.f32 %v2674_v26, %v2386_v37 }
 0x299   : > { %2450 = vst [vmem:[%s3986_s15 + $0x28] sm:$0xff] %v2387_v39 }
 0x2a1   : > { %v2960_v44 = vpop.f32.mrf.mxu0 }
 0x2a2   : > { %v2408_v59 = vadd.f32 %v2960_v44, %v2674_v26 }
 0x2a3   : > { %v2399_v43 = vpop.f32.mrf.mxu0 }
 0x2a4   : > { %2455 = vst [vmem:[%s3986_s15 + $0x50] sm:$0xff] %v2408_v59  ;;  %v2400_v45 = vadd.f32 %v2674_v26, %v2399_v43 }
 0x2a5   : > { %v2961_v46 = vpop.f32.mrf.mxu0 }
 0x2a6   : > { %2453 = vst [vmem:[%s3986_s15 + $0x40] sm:$0xff] %v2400_v45  ;;  %v2411_v47 = vadd.f32 %v2961_v46, %v2674_v26 }
 0x2a7   : > { %v2402_v49 = vpop.f32.mrf.mxu0 }
 0x2a8   : > { %2456 = vst [vmem:[%s3986_s15 + $0x58] sm:$0xff] %v2411_v47  ;;  %v2403_v48 = vadd.f32 %v2674_v26, %v2402_v49 }
 0x2aa   : > { %2454 = vst [vmem:[%s3986_s15 + $0x48] sm:$0xff] %v2403_v48 }
 0x2b3   : > { %v2964_v50 = vpop.f32.mrf.mxu1 }
 0x2b4   : > { %v2424_v53 = vadd.f32 %v2964_v50, %v2674_v26 }
 0x2b5   : > { %v2415_v24 = vpop.f32.mrf.mxu1 }
 0x2b6   : > { %2459 = vst [vmem:[%s3986_s15 + $0x70] sm:$0xff] %v2424_v53  ;;  %v2416_v54 = vadd.f32 %v2674_v26, %v2415_v24 }
 0x2b7   : > { %v2965_v52 = vpop.f32.mrf.mxu1 }
 0x2b8   : > { %2457 = vst [vmem:[%s3986_s15 + $0x60] sm:$0xff] %v2416_v54  ;;  %v2427_v42 = vadd.f32 %v2965_v52, %v2674_v26 }
 0x2b9   : > { %v2418_v57 = vpop.f32.mrf.mxu1 }
 0x2ba   : > { %2460 = vst [vmem:[%s3986_s15 + $0x78] sm:$0xff] %v2427_v42  ;;  %v2419_v58 = vadd.f32 %v2674_v26, %v2418_v57 }
 0x2bc   : > { %2458 = vst [vmem:[%s3986_s15 + $0x68] sm:$0xff] %v2419_v58 }
 0x2c0   : > { %v2968_v5 = vpop.f32.mrf.mxu1 }
 0x2c1   : > { %v2440_v60 = vadd.f32 %v2968_v5, %v2674_v26 }
 0x2c2   : > { %v2431_v56 = vpop.f32.mrf.mxu1 }
 0x2c3   : > { %2463 = vst [vmem:[%s3986_s15 + $0x90] sm:$0xff] %v2440_v60  ;;  %v2432_v61 = vadd.f32 %v2674_v26, %v2431_v56 }
 0x2c4   : > { %v2969_v62 = vpop.f32.mrf.mxu1 }
 0x2c5   : > { %2461 = vst [vmem:[%s3986_s15 + $0x80] sm:$0xff] %v2432_v61 }
 0x2c6   : > { %v2434_v63 = vpop.f32.mrf.mxu1 }
 0x2c7   : > { %v2435_v2 = vadd.f32 %v2674_v26, %v2434_v63 }
 0x2c9   : > { %2462 = vst [vmem:[%s3986_s15 + $0x88] sm:$0xff] %v2435_v2 }
 0x2ca PF: > { %p19_p9 = scmp.ge.s32.totalorder %s3474_s10, 4   ;;  %s4039_s21 = smov %s3334_s22 }
 0x2cb   : > { %s4040_s22 = smov %s3338_s23  ;;  %s4041_s23 = smov %s3485_s19 }
 0x2cc   : > { %s4042_s24 = smov %s3474_s10  ;;  %21 = sbr.rel (!%p19_p9) target bundleno = 6 (0x6), region = 105 }
 0x2d1   :  { %2486 = vsyncpa [#allocation3], 1 }
 0x2d2   :  { %2488 = vsyncpa [#allocation3 + $0x1], 1 }
 0x2d3   :  { %2489 = vsyncpa [#allocation7], 1 }
 0x2d4   :  { %2490 = vsyncpa [#allocation10], 1 }
 0x2d5   :  { %2491 = vsyncpa [#allocation4], 1 }
 0x2d6   :  { %2493 = vsyncpa [#allocation4 + $0x1], 1 }

</bundles_post_ra>
